<compile_context>
chip_gen: v7x
topology: tpu7x:2x2x1
jax: 0.10.0
libtpu: 0.0.40
codegen_flags: <defaults>
</compile_context>

<pallas_src>
from functools import partial

import jax
import jax.numpy as jnp
from jax.experimental import pallas as pl
from jax.experimental.pallas import tpu as pltpu


# ---------------------------------------------------------------------------
# Fused kernel: one grid point = (image n, band of Rb output rows).
# Refs (batch dim squeezed by the BlockSpecs):
#   xp_ref : (H+2, W+2, Cin)      bf16  zero-padded input image (resident per n)
#   w1_ref : (Cin, width)         bf16  1x1 conv, BN1 scale folded in
#   w2_ref : (3, 3, width, width) bf16  3x3 conv, BN2 scale folded in
#   w3_ref : (width, out_ch)      bf16  1x1 conv, BN3 scale folded in
#   b*_ref : (1, C)               f32   folded BN biases
#   o_ref  : (Rb, Wo, out_ch)     f32   output row band
#   acc_ref: (Rb*Wo, width)       f32   conv2 accumulator (VMEM scratch)
# ---------------------------------------------------------------------------
def _bottleneck_kernel(xp_ref, w1_ref, w2_ref, w3_ref, b1_ref, b2_ref, b3_ref,
                       o_ref, acc_ref, *, stride, row_hint):
    r = pl.program_id(1)

    Hp, Wp, cin = xp_ref.shape
    H, W = Hp - 2, Wp - 2
    Rb, Wo, _ = o_ref.shape
    width = w1_ref.shape[1]
    Rin = (Rb - 1) * stride + 3            # conv2-input rows needed (incl. halo)

    # ---- conv1 (1x1) + bias + ReLU on this row band (bf16 MXU, f32 accum) ----
    row0 = r * (Rb * stride)               # first padded-input row of the band
    if row_hint > 1:
        row0 = pl.multiple_of(row0, row_hint)
    xb = xp_ref[pl.ds(row0, Rin), :, :]    # (Rin, Wp, Cin) bf16, stays in VMEM
    h1 = jnp.dot(xb.reshape(Rin * Wp, cin), w1_ref[...],
                 preferred_element_type=jnp.float32)
    h1 = jnp.maximum(h1 + b1_ref[...], 0.0).reshape(Rin, Wp, width)

    # conv2 zero-pads its *input*: border positions must be exactly 0 (not
    # relu(bias1)), so mask out the 1-pixel halo ring here.
    grow = row0 + jax.lax.broadcasted_iota(jnp.int32, (Rin, Wp, 1), 0)
    gcol = jax.lax.broadcasted_iota(jnp.int32, (Rin, Wp, 1), 1)
    valid = (grow >= 1) & (grow <= H) & (gcol >= 1) & (gcol <= W)
    h1 = jnp.where(valid, h1, 0.0).astype(jnp.bfloat16)       # (Rin, Wp, width)

    # ---- conv2 (3x3, stride, pad=1): 9 channel matmuls ----
    # Per dy: the row slice is hoisted, dx taps are accumulated in registers,
    # and the scratch accumulator is updated once (3 RMWs total).
    for dy in range(3):
        rows = h1[dy:dy + (Rb - 1) * stride + 1:stride, :, :]   # (Rb, *, width)
        # Split columns into `stride` parity planes once per dy so every dx tap
        # below is a contiguous (unstrided) slice along the sublane axis.
        planes = [rows[:, p::stride, :] for p in range(stride)]
        part = None
        for dx in range(3):
            win = planes[dx % stride][:, dx // stride:dx // stride + Wo, :]
            contrib = jnp.dot(win.reshape(Rb * Wo, width), w2_ref[dy, dx],
                              preferred_element_type=jnp.float32)
            part = contrib if part is None else part + contrib
        if dy == 0:
            acc_ref[...] = part
        else:
            acc_ref[...] += part
    h2 = jnp.maximum(acc_ref[...] + b2_ref[...], 0.0).astype(jnp.bfloat16)

    # ---- conv3 (1x1) + bias + ReLU (lane-dense output write) ----
    y = jnp.dot(h2, w3_ref[...], preferred_element_type=jnp.float32)
    y = jnp.maximum(y + b3_ref[...], 0.0)
    o_ref[...] = y.reshape(Rb, Wo, -1).astype(o_ref.dtype)


# ---------------------------------------------------------------------------
# Wrapper helpers
# ---------------------------------------------------------------------------
def _pick_block_rows(Ho, Wo, target_m=512):
    """Largest divisor of Ho keeping the (rows*Wo) MXU panel <= target_m, while
    preferring >= 2 row blocks so the grid has depth (pipelining / 2nd core)."""
    divs = [d for d in range(1, Ho + 1) if Ho % d == 0]
    cand = [d for d in divs if d * Wo <= target_m] or [1]
    rb = cand[-1]
    if rb == Ho and len(cand) > 1:
        rb = cand[-2]
    return rb


def _row_hint(step):
    """Largest power of two (<= 8) dividing the per-band row step."""
    hint = 1
    while hint < 8 and step % (hint * 2) == 0:
        hint *= 2
    return hint


def _vmem_budget(Hp, Wp, Cin, width, out_ch, Rb, Wo, Rin):
    bf16, f32 = 2, 4
    est = 0
    est += 2 * Hp * Wp * Cin * bf16                                  # image x2 (dbl buf)
    est += 2 * (Cin * width + 9 * width * width + width * out_ch) * bf16
    est += 2 * (2 * width + out_ch) * f32
    est += 2 * Rb * Wo * out_ch * f32                                # output band x2
    est += Rb * Wo * width * f32                                     # conv2 accumulator
    est += 6 * Rin * Wp * max(Cin, width) * f32                      # in-kernel temps
    return int(min(max(32 * 1024 * 1024, 2 * est), 64 * 1024 * 1024))


def fold_bottleneck_params(raw, eps=1e-5):
    """Fold eval-mode BN into the conv weights/biases; cast weights to bf16."""
    def fold(w, bn):
        gamma, beta, mean, var = bn
        scale = gamma / jnp.sqrt(var + eps)                 # (Cout,)
        bias = beta - mean * scale
        return (w * scale).astype(jnp.bfloat16), bias.reshape(1, -1).astype(jnp.float32)

    w1, b1 = fold(raw["w1"], raw["bn1"])
    w2, b2 = fold(raw["w2"], raw["bn2"])
    w3, b3 = fold(raw["w3"], raw["bn3"])
    return {"w1": w1, "w2": w2, "w3": w3, "b1": b1, "b2": b2, "b3": b3}


def make_bottleneck_params(key, inplanes, planes, groups=1, base_width=64):
    assert groups == 1  # TODO(synk): grouped 3x3 conv not implemented.
    width = int(planes * (base_width / 64.0)) * groups
    out_ch = planes * 4  # expansion = 4
    ks = jax.random.split(key, 6)

    def bn(k, c):
        gamma = 1.0 + 0.1 * jax.random.normal(k, (c,), jnp.float32)
        beta = 0.05 * jax.random.normal(jax.random.fold_in(k, 1), (c,), jnp.float32)
        mean = 0.02 * jax.random.normal(jax.random.fold_in(k, 2), (c,), jnp.float32)
        var = 1.0 + 0.1 * jax.random.uniform(jax.random.fold_in(k, 3), (c,), jnp.float32)
        return (gamma, beta, mean, var)

    return {
        # conv1x1 weights stored [Cin, Cout]; conv3x3 stored HWIO [3,3,Cin,Cout]
        "w1": 0.1 * jax.random.normal(ks[0], (inplanes, width), jnp.float32),
        "w2": 0.1 * jax.random.normal(ks[1], (3, 3, width, width), jnp.float32),
        "w3": 0.1 * jax.random.normal(ks[2], (width, out_ch), jnp.float32),
        "bn1": bn(ks[3], width),
        "bn2": bn(ks[4], width),
        "bn3": bn(ks[5], out_ch),
    }


def bottleneck_forward(x_nchw, fp, *, stride=1, block_rows=None):
    """x_nchw: [N, Cin, H, W] f32 (PyTorch convention). fp: folded params.
    Returns NCHW f32."""
    N, Cin, H, W = x_nchw.shape
    width = fp["w1"].shape[1]
    out_ch = fp["w3"].shape[1]
    Ho = (H + 2 - 3) // stride + 1
    Wo = (W + 2 - 3) // stride + 1
    Hp, Wp = H + 2, W + 2

    # NHWC + bf16 activations for the MXU.
    # TODO(synk): drop the NCHW<->NHWC transposes if the surrounding network
    # already runs channels-last.
    x = jnp.transpose(x_nchw, (0, 2, 3, 1)).astype(jnp.bfloat16)
    # 1-pixel zero halo (pad values are masked to exact zeros in-kernel).
    xp = jnp.pad(x, ((0, 0), (1, 1), (1, 1), (0, 0)))

    Rb = block_rows if (block_rows is not None and Ho % block_rows == 0) \
        else _pick_block_rows(Ho, Wo)
    Rin = (Rb - 1) * stride + 3
    grid = (N, Ho // Rb)

    out_nhwc = pl.pallas_call(
        partial(_bottleneck_kernel, stride=stride, row_hint=_row_hint(Rb * stride)),
        out_shape=jax.ShapeDtypeStruct((N, Ho, Wo, out_ch), jnp.float32),
        grid_spec=pltpu.PrefetchScalarGridSpec(
            num_scalar_prefetch=0,
            grid=grid,
            in_specs=[
                # Full padded image per n (block index constant across the row
                # axis -> DMA'd once per image, re-used by every row band).
                pl.BlockSpec((None, Hp, Wp, Cin), lambda n, r: (n, 0, 0, 0)),
                pl.BlockSpec((Cin, width), lambda n, r: (0, 0)),
                pl.BlockSpec((3, 3, width, width), lambda n, r: (0, 0, 0, 0)),
                pl.BlockSpec((width, out_ch), lambda n, r: (0, 0)),
                pl.BlockSpec((1, width), lambda n, r: (0, 0)),
                pl.BlockSpec((1, width), lambda n, r: (0, 0)),
                pl.BlockSpec((1, out_ch), lambda n, r: (0, 0)),
            ],
            out_specs=pl.BlockSpec((None, Rb, Wo, out_ch), lambda n, r: (n, r, 0, 0)),
            scratch_shapes=[pltpu.VMEM((Rb * Wo, width), jnp.float32)],
        ),
        compiler_params=pltpu.CompilerParams(
            dimension_semantics=("parallel", "parallel"),
            vmem_limit_bytes=_vmem_budget(Hp, Wp, Cin, width, out_ch, Rb, Wo, Rin),
        ),
    )(xp, fp["w1"], fp["w2"], fp["w3"], fp["b1"], fp["b2"], fp["b3"])
    return jnp.transpose(out_nhwc, (0, 3, 1, 2))


# ---------------------------------------------------------------------------
# Pure-JAX reference (same precision policy: bf16 matmul inputs, f32 accum)
# ---------------------------------------------------------------------------
def bottleneck_reference(x_nchw, fp, *, stride=1):
    x = jnp.transpose(x_nchw, (0, 2, 3, 1)).astype(jnp.bfloat16)

    y = jax.lax.dot_general(x, fp["w1"], (((3,), (0,)), ((), ())),
                            preferred_element_type=jnp.float32)
    y = jnp.maximum(y + fp["b1"][0], 0.0).astype(jnp.bfloat16)

    y = jax.lax.conv_general_dilated(
        y, fp["w2"], window_strides=(stride, stride), padding=((1, 1), (1, 1)),
        dimension_numbers=("NHWC", "HWIO", "NHWC"),
        preferred_element_type=jnp.float32)
    y = jnp.maximum(y + fp["b2"][0], 0.0).astype(jnp.bfloat16)

    y = jax.lax.dot_general(y, fp["w3"], (((3,), (0,)), ((), ())),
                            preferred_element_type=jnp.float32)
    y = jnp.maximum(y + fp["b3"][0], 0.0)
    return jnp.transpose(y, (0, 3, 1, 2))


if __name__ == "__main__":
    key = jax.random.PRNGKey(0)
    kx, kp = jax.random.split(key)

    # Bottleneck(inplanes=64, planes=32): width=32, out_ch=128 (lane-dense out).
    N, Cin, H, W = 2, 64, 16, 16
    inplanes, planes = Cin, 32

    x = jax.random.normal(kx, (N, Cin, H, W), jnp.float32)
    raw = make_bottleneck_params(kp, inplanes, planes)
    fp = fold_bottleneck_params(raw)

    fwd = jax.jit(bottleneck_forward, static_argnames=("stride", "block_rows"))

    for stride in (1, 2):
        out = jax.block_until_ready(fwd(x, fp, stride=stride))
        ref = jax.block_until_ready(bottleneck_reference(x, fp, stride=stride))
        Ho = (H + 2 - 3) // stride + 1
        assert out.shape == (N, planes * 4, Ho, Ho), (stride, out.shape)
        err = float(jnp.max(jnp.abs(out - ref)))
        assert jnp.allclose(out, ref, atol=5e-3, rtol=5e-3), (stride, err)

    print("KERNEL_OK")
</pallas_src>

<mosaic_0001>
module attributes {stable_mosaic.version = 11 : i64} {
  func.func @_bottleneck_kernel(%arg0: i32, %arg1: i32, %arg2: memref<1x18x18x64xbf16, #tpu.memory_space<vmem>>, %arg3: memref<64x32xbf16, #tpu.memory_space<vmem>>, %arg4: memref<3x3x32x32xbf16, #tpu.memory_space<vmem>>, %arg5: memref<32x128xbf16, #tpu.memory_space<vmem>>, %arg6: memref<1x32xf32, #tpu.memory_space<vmem>>, %arg7: memref<1x32xf32, #tpu.memory_space<vmem>>, %arg8: memref<1x128xf32, #tpu.memory_space<vmem>>, %arg9: memref<1x8x16x128xf32, #tpu.memory_space<vmem>>, %arg10: memref<128x32xf32, #tpu.memory_space<vmem>>) attributes {dimension_semantics = [#tpu.dimension_semantics<parallel>, #tpu.dimension_semantics<parallel>], iteration_bounds = array<i64: 2, 2>, scalar_prefetch = 0 : i64, scratch_operands = 1 : i64, tpu.core_type = #tpu.core_type<tc>, window_params = [{transform_indices = @transform_0, window_bounds = array<i64: 1, 18, 18, 64>}, {pipeline_mode = #tpu.pipeline_mode<synchronous>, transform_indices = @transform_1, window_bounds = array<i64: 64, 32>}, {pipeline_mode = #tpu.pipeline_mode<synchronous>, transform_indices = @transform_2, window_bounds = array<i64: 3, 3, 32, 32>}, {pipeline_mode = #tpu.pipeline_mode<synchronous>, transform_indices = @transform_3, window_bounds = array<i64: 32, 128>}, {pipeline_mode = #tpu.pipeline_mode<synchronous>, transform_indices = @transform_4, window_bounds = array<i64: 1, 32>}, {pipeline_mode = #tpu.pipeline_mode<synchronous>, transform_indices = @transform_5, window_bounds = array<i64: 1, 32>}, {pipeline_mode = #tpu.pipeline_mode<synchronous>, transform_indices = @transform_6, window_bounds = array<i64: 1, 128>}, {transform_indices = @transform_7, window_bounds = array<i64: 1, 8, 16, 128>}]} {
    %c8_i32 = arith.constant 8 : i32
    %0 = arith.muli %arg1, %c8_i32 : i32
    %1 = tpu.assume_multiple %0, 8 : i32
    %c0 = arith.constant 0 : index
    %2 = arith.index_cast %1 : i32 to index
    %c0_0 = arith.constant 0 : index
    %c0_1 = arith.constant 0 : index
    %3 = vector.load %arg2[%c0, %2, %c0_0, %c0_1] : memref<1x18x18x64xbf16, #tpu.memory_space<vmem>>, vector<1x10x18x64xbf16>
    %4 = vector.shape_cast %3 : vector<1x10x18x64xbf16> to vector<10x18x64xbf16>
    %5 = vector.shape_cast %4 : vector<10x18x64xbf16> to vector<180x64xbf16>
    %c0_2 = arith.constant 0 : index
    %c0_3 = arith.constant 0 : index
    %6 = vector.load %arg3[%c0_2, %c0_3] : memref<64x32xbf16, #tpu.memory_space<vmem>>, vector<64x32xbf16>
    %cst = arith.constant dense<0.000000e+00> : vector<180x32xf32>
    %7 = tpu.matmul %5, %6, %cst {dimension_numbers = #tpu.dot_dimension_numbers<[1], [0], [0], [1], [0, 0, 1, 1], [], []>} : vector<180x64xbf16>, vector<64x32xbf16>, vector<180x32xf32> -> vector<180x32xf32>
    %c0_4 = arith.constant 0 : index
    %c0_5 = arith.constant 0 : index
    %8 = vector.load %arg6[%c0_4, %c0_5] : memref<1x32xf32, #tpu.memory_space<vmem>>, vector<1x32xf32>
    %9 = vector.broadcast %8 : vector<1x32xf32> to vector<180x32xf32>
    %10 = arith.addf %7, %9 : vector<180x32xf32>
    %cst_6 = arith.constant 0.000000e+00 : f32
    %11 = vector.broadcast %cst_6 : f32 to vector<180x32xf32>
    %12 = arith.maximumf %10, %11 : vector<180x32xf32>
    %13 = vector.shape_cast %12 : vector<180x32xf32> to vector<10x18x32xf32>
    %14 = tpu.iota {dimensions = array<i32: 0>} : vector<10x18x1xi32>
    %15 = vector.broadcast %1 : i32 to vector<10x18x1xi32>
    %16 = arith.addi %15, %14 : vector<10x18x1xi32>
    %17 = tpu.iota {dimensions = array<i32: 1>} : vector<10x18x1xi32>
    %c1_i32 = arith.constant 1 : i32
    %18 = vector.broadcast %c1_i32 : i32 to vector<10x18x1xi32>
    %19 = arith.cmpi sge, %16, %18 : vector<10x18x1xi32>
    %c16_i32 = arith.constant 16 : i32
    %20 = vector.broadcast %c16_i32 : i32 to vector<10x18x1xi32>
    %21 = arith.cmpi sle, %16, %20 : vector<10x18x1xi32>
    %22 = arith.andi %19, %21 : vector<10x18x1xi1>
    %c1_i32_7 = arith.constant 1 : i32
    %23 = vector.broadcast %c1_i32_7 : i32 to vector<10x18x1xi32>
    %24 = arith.cmpi sge, %17, %23 : vector<10x18x1xi32>
    %25 = arith.andi %22, %24 : vector<10x18x1xi1>
    %c16_i32_8 = arith.constant 16 : i32
    %26 = vector.broadcast %c16_i32_8 : i32 to vector<10x18x1xi32>
    %27 = arith.cmpi sle, %17, %26 : vector<10x18x1xi32>
    %28 = arith.andi %25, %27 : vector<10x18x1xi1>
    %cst_9 = arith.constant 0.000000e+00 : f32
    %29 = vector.shape_cast %28 : vector<10x18x1xi1> to vector<10x18x1xi1>
    %30 = vector.broadcast %29 : vector<10x18x1xi1> to vector<10x18x32xi1>
    %31 = vector.broadcast %cst_9 : f32 to vector<10x18x32xf32>
    %32 = arith.select %30, %13, %31 : vector<10x18x32xi1>, vector<10x18x32xf32>
    %33 = arith.truncf %32 : vector<10x18x32xf32> to vector<10x18x32xbf16>
    %34 = vector.extract_strided_slice %33 {offsets = [0, 0, 0], sizes = [8, 18, 32], strides = [1, 1, 1]} : vector<10x18x32xbf16> to vector<8x18x32xbf16>
    %35 = vector.extract_strided_slice %34 {offsets = [0, 0, 0], sizes = [8, 16, 32], strides = [1, 1, 1]} : vector<8x18x32xbf16> to vector<8x16x32xbf16>
    %36 = vector.shape_cast %35 : vector<8x16x32xbf16> to vector<128x32xbf16>
    %c0_10 = arith.constant 0 : index
    %c0_11 = arith.constant 0 : index
    %c0_12 = arith.constant 0 : index
    %c0_13 = arith.constant 0 : index
    %37 = vector.load %arg4[%c0_10, %c0_11, %c0_12, %c0_13] : memref<3x3x32x32xbf16, #tpu.memory_space<vmem>>, vector<1x1x32x32xbf16>
    %38 = vector.shape_cast %37 : vector<1x1x32x32xbf16> to vector<32x32xbf16>
    %cst_14 = arith.constant dense<0.000000e+00> : vector<128x32xf32>
    %39 = tpu.matmul %36, %38, %cst_14 {dimension_numbers = #tpu.dot_dimension_numbers<[1], [0], [0], [1], [0, 0, 1, 1], [], []>} : vector<128x32xbf16>, vector<32x32xbf16>, vector<128x32xf32> -> vector<128x32xf32>
    %40 = vector.extract_strided_slice %34 {offsets = [0, 1, 0], sizes = [8, 16, 32], strides = [1, 1, 1]} : vector<8x18x32xbf16> to vector<8x16x32xbf16>
    %41 = vector.shape_cast %40 : vector<8x16x32xbf16> to vector<128x32xbf16>
    %c0_15 = arith.constant 0 : index
    %c1 = arith.constant 1 : index
    %c0_16 = arith.constant 0 : index
    %c0_17 = arith.constant 0 : index
    %42 = vector.load %arg4[%c0_15, %c1, %c0_16, %c0_17] : memref<3x3x32x32xbf16, #tpu.memory_space<vmem>>, vector<1x1x32x32xbf16>
    %43 = vector.shape_cast %42 : vector<1x1x32x32xbf16> to vector<32x32xbf16>
    %cst_18 = arith.constant dense<0.000000e+00> : vector<128x32xf32>
    %44 = tpu.matmul %41, %43, %cst_18 {dimension_numbers = #tpu.dot_dimension_numbers<[1], [0], [0], [1], [0, 0, 1, 1], [], []>} : vector<128x32xbf16>, vector<32x32xbf16>, vector<128x32xf32> -> vector<128x32xf32>
    %45 = arith.addf %39, %44 : vector<128x32xf32>
    %46 = vector.extract_strided_slice %34 {offsets = [0, 2, 0], sizes = [8, 16, 32], strides = [1, 1, 1]} : vector<8x18x32xbf16> to vector<8x16x32xbf16>
    %47 = vector.shape_cast %46 : vector<8x16x32xbf16> to vector<128x32xbf16>
    %c0_19 = arith.constant 0 : index
    %c2 = arith.constant 2 : index
    %c0_20 = arith.constant 0 : index
    %c0_21 = arith.constant 0 : index
    %48 = vector.load %arg4[%c0_19, %c2, %c0_20, %c0_21] : memref<3x3x32x32xbf16, #tpu.memory_space<vmem>>, vector<1x1x32x32xbf16>
    %49 = vector.shape_cast %48 : vector<1x1x32x32xbf16> to vector<32x32xbf16>
    %cst_22 = arith.constant dense<0.000000e+00> : vector<128x32xf32>
    %50 = tpu.matmul %47, %49, %cst_22 {dimension_numbers = #tpu.dot_dimension_numbers<[1], [0], [0], [1], [0, 0, 1, 1], [], []>} : vector<128x32xbf16>, vector<32x32xbf16>, vector<128x32xf32> -> vector<128x32xf32>
    %51 = arith.addf %45, %50 : vector<128x32xf32>
    %c0_23 = arith.constant 0 : index
    %c0_24 = arith.constant 0 : index
    %52 = vector.load %arg10[%c0_23, %c0_24] : memref<128x32xf32, #tpu.memory_space<vmem>>, vector<128x32xf32>
    tpu.vector_store %arg10[%c0_23, %c0_24], %51 {strides = array<i32>} : memref<128x32xf32, #tpu.memory_space<vmem>>, vector<128x32xf32>,
    %53 = vector.extract_strided_slice %33 {offsets = [1, 0, 0], sizes = [8, 18, 32], strides = [1, 1, 1]} : vector<10x18x32xbf16> to vector<8x18x32xbf16>
    %54 = vector.extract_strided_slice %53 {offsets = [0, 0, 0], sizes = [8, 16, 32], strides = [1, 1, 1]} : vector<8x18x32xbf16> to vector<8x16x32xbf16>
    %55 = vector.shape_cast %54 : vector<8x16x32xbf16> to vector<128x32xbf16>
    %c1_25 = arith.constant 1 : index
    %c0_26 = arith.constant 0 : index
    %c0_27 = arith.constant 0 : index
    %c0_28 = arith.constant 0 : index
    %56 = vector.load %arg4[%c1_25, %c0_26, %c0_27, %c0_28] : memref<3x3x32x32xbf16, #tpu.memory_space<vmem>>, vector<1x1x32x32xbf16>
    %57 = vector.shape_cast %56 : vector<1x1x32x32xbf16> to vector<32x32xbf16>
    %cst_29 = arith.constant dense<0.000000e+00> : vector<128x32xf32>
    %58 = tpu.matmul %55, %57, %cst_29 {dimension_numbers = #tpu.dot_dimension_numbers<[1], [0], [0], [1], [0, 0, 1, 1], [], []>} : vector<128x32xbf16>, vector<32x32xbf16>, vector<128x32xf32> -> vector<128x32xf32>
    %59 = vector.extract_strided_slice %53 {offsets = [0, 1, 0], sizes = [8, 16, 32], strides = [1, 1, 1]} : vector<8x18x32xbf16> to vector<8x16x32xbf16>
    %60 = vector.shape_cast %59 : vector<8x16x32xbf16> to vector<128x32xbf16>
    %c1_30 = arith.constant 1 : index
    %c1_31 = arith.constant 1 : index
    %c0_32 = arith.constant 0 : index
    %c0_33 = arith.constant 0 : index
    %61 = vector.load %arg4[%c1_30, %c1_31, %c0_32, %c0_33] : memref<3x3x32x32xbf16, #tpu.memory_space<vmem>>, vector<1x1x32x32xbf16>
    %62 = vector.shape_cast %61 : vector<1x1x32x32xbf16> to vector<32x32xbf16>
    %cst_34 = arith.constant dense<0.000000e+00> : vector<128x32xf32>
    %63 = tpu.matmul %60, %62, %cst_34 {dimension_numbers = #tpu.dot_dimension_numbers<[1], [0], [0], [1], [0, 0, 1, 1], [], []>} : vector<128x32xbf16>, vector<32x32xbf16>, vector<128x32xf32> -> vector<128x32xf32>
    %64 = arith.addf %58, %63 : vector<128x32xf32>
    %65 = vector.extract_strided_slice %53 {offsets = [0, 2, 0], sizes = [8, 16, 32], strides = [1, 1, 1]} : vector<8x18x32xbf16> to vector<8x16x32xbf16>
    %66 = vector.shape_cast %65 : vector<8x16x32xbf16> to vector<128x32xbf16>
    %c1_35 = arith.constant 1 : index
    %c2_36 = arith.constant 2 : index
    %c0_37 = arith.constant 0 : index
    %c0_38 = arith.constant 0 : index
    %67 = vector.load %arg4[%c1_35, %c2_36, %c0_37, %c0_38] : memref<3x3x32x32xbf16, #tpu.memory_space<vmem>>, vector<1x1x32x32xbf16>
    %68 = vector.shape_cast %67 : vector<1x1x32x32xbf16> to vector<32x32xbf16>
    %cst_39 = arith.constant dense<0.000000e+00> : vector<128x32xf32>
    %69 = tpu.matmul %66, %68, %cst_39 {dimension_numbers = #tpu.dot_dimension_numbers<[1], [0], [0], [1], [0, 0, 1, 1], [], []>} : vector<128x32xbf16>, vector<32x32xbf16>, vector<128x32xf32> -> vector<128x32xf32>
    %70 = arith.addf %64, %69 : vector<128x32xf32>
    %c0_40 = arith.constant 0 : index
    %c0_41 = arith.constant 0 : index
    %71 = vector.load %arg10[%c0_40, %c0_41] : memref<128x32xf32, #tpu.memory_space<vmem>>, vector<128x32xf32>
    %72 = arith.addf %71, %70 : vector<128x32xf32>
    %c0_42 = arith.constant 0 : index
    %c0_43 = arith.constant 0 : index
    %73 = vector.load %arg10[%c0_42, %c0_43] : memref<128x32xf32, #tpu.memory_space<vmem>>, vector<128x32xf32>
    tpu.vector_store %arg10[%c0_42, %c0_43], %72 {strides = array<i32>} : memref<128x32xf32, #tpu.memory_space<vmem>>, vector<128x32xf32>,
    %74 = vector.extract_strided_slice %33 {offsets = [2, 0, 0], sizes = [8, 18, 32], strides = [1, 1, 1]} : vector<10x18x32xbf16> to vector<8x18x32xbf16>
    %75 = vector.extract_strided_slice %74 {offsets = [0, 0, 0], sizes = [8, 16, 32], strides = [1, 1, 1]} : vector<8x18x32xbf16> to vector<8x16x32xbf16>
    %76 = vector.shape_cast %75 : vector<8x16x32xbf16> to vector<128x32xbf16>
    %c2_44 = arith.constant 2 : index
    %c0_45 = arith.constant 0 : index
    %c0_46 = arith.constant 0 : index
    %c0_47 = arith.constant 0 : index
    %77 = vector.load %arg4[%c2_44, %c0_45, %c0_46, %c0_47] : memref<3x3x32x32xbf16, #tpu.memory_space<vmem>>, vector<1x1x32x32xbf16>
    %78 = vector.shape_cast %77 : vector<1x1x32x32xbf16> to vector<32x32xbf16>
    %cst_48 = arith.constant dense<0.000000e+00> : vector<128x32xf32>
    %79 = tpu.matmul %76, %78, %cst_48 {dimension_numbers = #tpu.dot_dimension_numbers<[1], [0], [0], [1], [0, 0, 1, 1], [], []>} : vector<128x32xbf16>, vector<32x32xbf16>, vector<128x32xf32> -> vector<128x32xf32>
    %80 = vector.extract_strided_slice %74 {offsets = [0, 1, 0], sizes = [8, 16, 32], strides = [1, 1, 1]} : vector<8x18x32xbf16> to vector<8x16x32xbf16>
    %81 = vector.shape_cast %80 : vector<8x16x32xbf16> to vector<128x32xbf16>
    %c2_49 = arith.constant 2 : index
    %c1_50 = arith.constant 1 : index
    %c0_51 = arith.constant 0 : index
    %c0_52 = arith.constant 0 : index
    %82 = vector.load %arg4[%c2_49, %c1_50, %c0_51, %c0_52] : memref<3x3x32x32xbf16, #tpu.memory_space<vmem>>, vector<1x1x32x32xbf16>
    %83 = vector.shape_cast %82 : vector<1x1x32x32xbf16> to vector<32x32xbf16>
    %cst_53 = arith.constant dense<0.000000e+00> : vector<128x32xf32>
    %84 = tpu.matmul %81, %83, %cst_53 {dimension_numbers = #tpu.dot_dimension_numbers<[1], [0], [0], [1], [0, 0, 1, 1], [], []>} : vector<128x32xbf16>, vector<32x32xbf16>, vector<128x32xf32> -> vector<128x32xf32>
    %85 = arith.addf %79, %84 : vector<128x32xf32>
    %86 = vector.extract_strided_slice %74 {offsets = [0, 2, 0], sizes = [8, 16, 32], strides = [1, 1, 1]} : vector<8x18x32xbf16> to vector<8x16x32xbf16>
    %87 = vector.shape_cast %86 : vector<8x16x32xbf16> to vector<128x32xbf16>
    %c2_54 = arith.constant 2 : index
    %c2_55 = arith.constant 2 : index
    %c0_56 = arith.constant 0 : index
    %c0_57 = arith.constant 0 : index
    %88 = vector.load %arg4[%c2_54, %c2_55, %c0_56, %c0_57] : memref<3x3x32x32xbf16, #tpu.memory_space<vmem>>, vector<1x1x32x32xbf16>
    %89 = vector.shape_cast %88 : vector<1x1x32x32xbf16> to vector<32x32xbf16>
    %cst_58 = arith.constant dense<0.000000e+00> : vector<128x32xf32>
    %90 = tpu.matmul %87, %89, %cst_58 {dimension_numbers = #tpu.dot_dimension_numbers<[1], [0], [0], [1], [0, 0, 1, 1], [], []>} : vector<128x32xbf16>, vector<32x32xbf16>, vector<128x32xf32> -> vector<128x32xf32>
    %91 = arith.addf %85, %90 : vector<128x32xf32>
    %c0_59 = arith.constant 0 : index
    %c0_60 = arith.constant 0 : index
    %92 = vector.load %arg10[%c0_59, %c0_60] : memref<128x32xf32, #tpu.memory_space<vmem>>, vector<128x32xf32>
    %93 = arith.addf %92, %91 : vector<128x32xf32>
    %c0_61 = arith.constant 0 : index
    %c0_62 = arith.constant 0 : index
    %94 = vector.load %arg10[%c0_61, %c0_62] : memref<128x32xf32, #tpu.memory_space<vmem>>, vector<128x32xf32>
    tpu.vector_store %arg10[%c0_61, %c0_62], %93 {strides = array<i32>} : memref<128x32xf32, #tpu.memory_space<vmem>>, vector<128x32xf32>,
    %c0_63 = arith.constant 0 : index
    %c0_64 = arith.constant 0 : index
    %95 = vector.load %arg10[%c0_63, %c0_64] : memref<128x32xf32, #tpu.memory_space<vmem>>, vector<128x32xf32>
    %c0_65 = arith.constant 0 : index
    %c0_66 = arith.constant 0 : index
    %96 = vector.load %arg7[%c0_65, %c0_66] : memref<1x32xf32, #tpu.memory_space<vmem>>, vector<1x32xf32>
    %97 = vector.broadcast %96 : vector<1x32xf32> to vector<128x32xf32>
    %98 = arith.addf %95, %97 : vector<128x32xf32>
    %cst_67 = arith.constant 0.000000e+00 : f32
    %99 = vector.broadcast %cst_67 : f32 to vector<128x32xf32>
    %100 = arith.maximumf %98, %99 : vector<128x32xf32>
    %101 = arith.truncf %100 : vector<128x32xf32> to vector<128x32xbf16>
    %c0_68 = arith.constant 0 : index
    %c0_69 = arith.constant 0 : index
    %102 = vector.load %arg5[%c0_68, %c0_69] : memref<32x128xbf16, #tpu.memory_space<vmem>>, vector<32x128xbf16>
    %cst_70 = arith.constant dense<0.000000e+00> : vector<128x128xf32>
    %103 = tpu.matmul %101, %102, %cst_70 {dimension_numbers = #tpu.dot_dimension_numbers<[1], [0], [0], [1], [0, 0, 1, 1], [], []>} : vector<128x32xbf16>, vector<32x128xbf16>, vector<128x128xf32> -> vector<128x128xf32>
    %c0_71 = arith.constant 0 : index
    %c0_72 = arith.constant 0 : index
    %104 = vector.load %arg8[%c0_71, %c0_72] : memref<1x128xf32, #tpu.memory_space<vmem>>, vector<1x128xf32>
    %105 = vector.broadcast %104 : vector<1x128xf32> to vector<128x128xf32>
    %106 = arith.addf %103, %105 : vector<128x128xf32>
    %cst_73 = arith.constant 0.000000e+00 : f32
    %107 = vector.broadcast %cst_73 : f32 to vector<128x128xf32>
    %108 = arith.maximumf %106, %107 : vector<128x128xf32>
    %109 = vector.shape_cast %108 : vector<128x128xf32> to vector<8x16x128xf32>
    %c0_74 = arith.constant 0 : index
    %c0_75 = arith.constant 0 : index
    %c0_76 = arith.constant 0 : index
    %c0_77 = arith.constant 0 : index
    %110 = vector.load %arg9[%c0_74, %c0_75, %c0_76, %c0_77] : memref<1x8x16x128xf32, #tpu.memory_space<vmem>>, vector<1x8x16x128xf32>
    %111 = vector.shape_cast %110 : vector<1x8x16x128xf32> to vector<8x16x128xf32>
    %112 = vector.shape_cast %109 : vector<8x16x128xf32> to vector<1x8x16x128xf32>
    tpu.vector_store %arg9[%c0_74, %c0_75, %c0_76, %c0_77], %112 {strides = array<i32>} : memref<1x8x16x128xf32, #tpu.memory_space<vmem>>, vector<1x8x16x128xf32>,
    return
  }
  func.func @transform_0(%arg0: i32, %arg1: i32) -> (i32, i32, i32, i32) {
    %c0_i32 = arith.constant 0 : i32
    %c0_i32_0 = arith.constant 0 : i32
    %c0_i32_1 = arith.constant 0 : i32
    %c0_i32_2 = arith.constant 0 : i32
    return %arg0, %c0_i32, %c0_i32_0, %c0_i32_1 : i32, i32, i32, i32
  }
  func.func @transform_1(%arg0: i32, %arg1: i32) -> (i32, i32) {
    %c0_i32 = arith.constant 0 : i32
    %c0_i32_0 = arith.constant 0 : i32
    %c0_i32_1 = arith.constant 0 : i32
    return %c0_i32, %c0_i32_0 : i32, i32
  }
  func.func @transform_2(%arg0: i32, %arg1: i32) -> (i32, i32, i32, i32) {
    %c0_i32 = arith.constant 0 : i32
    %c0_i32_0 = arith.constant 0 : i32
    %c0_i32_1 = arith.constant 0 : i32
    %c0_i32_2 = arith.constant 0 : i32
    %c0_i32_3 = arith.constant 0 : i32
    return %c0_i32, %c0_i32_0, %c0_i32_1, %c0_i32_2 : i32, i32, i32, i32
  }
  func.func @transform_3(%arg0: i32, %arg1: i32) -> (i32, i32) {
    %c0_i32 = arith.constant 0 : i32
    %c0_i32_0 = arith.constant 0 : i32
    %c0_i32_1 = arith.constant 0 : i32
    return %c0_i32, %c0_i32_0 : i32, i32
  }
  func.func @transform_4(%arg0: i32, %arg1: i32) -> (i32, i32) {
    %c0_i32 = arith.constant 0 : i32
    %c0_i32_0 = arith.constant 0 : i32
    %c0_i32_1 = arith.constant 0 : i32
    return %c0_i32, %c0_i32_0 : i32, i32
  }
  func.func @transform_5(%arg0: i32, %arg1: i32) -> (i32, i32) {
    %c0_i32 = arith.constant 0 : i32
    %c0_i32_0 = arith.constant 0 : i32
    %c0_i32_1 = arith.constant 0 : i32
    return %c0_i32, %c0_i32_0 : i32, i32
  }
  func.func @transform_6(%arg0: i32, %arg1: i32) -> (i32, i32) {
    %c0_i32 = arith.constant 0 : i32
    %c0_i32_0 = arith.constant 0 : i32
    %c0_i32_1 = arith.constant 0 : i32
    return %c0_i32, %c0_i32_0 : i32, i32
  }
  func.func @transform_7(%arg0: i32, %arg1: i32) -> (i32, i32, i32, i32) {
    %c0_i32 = arith.constant 0 : i32
    %c0_i32_0 = arith.constant 0 : i32
    %c0_i32_1 = arith.constant 0 : i32
    return %arg0, %arg1, %c0_i32, %c0_i32_0 : i32, i32, i32, i32
  }
}

</mosaic_0001>

<bundles_post_ra>
// kernel: bottleneck_forward.1
= control target key start
LH: loop header
LB: loop body
LE: loop exit
PB: predicated region body
PF: predicated region fallthrough
CT: control target
= control target key end

     0   :  { %12 = vsyncpa [#allocation4], 0  ;;  %s6764_s0 = inlined_call_operand.vmem [shape: bf16[2,18,18,64], index: 0, kind: input, shape index: {}]   ;;  %s6765_s1 = inlined_call_operand.vmem [shape: bf16[64,32], index: 1, kind: input, shape index: {}]   ;;  %s6766_s2 = inlined_call_operand.vmem [shape: bf16[3,3,32,32], index: 2, kind: input, shape index: {}]   ;;  %s6767_s3 = inlined_call_operand.vmem [shape: bf16[32,128], index: 3, kind: input, shape index: {}]   ;;  %s6768_s4 = inlined_call_operand.vmem [shape: f32[1,32], index: 4, kind: input, shape index: {}]   ;;  %s6769_s5 = inlined_call_operand.vmem [shape: f32[1,32], index: 5, kind: input, shape index: {}]   ;;  %s6770_s6 = inlined_call_operand.vmem [shape: f32[1,128], index: 6, kind: input, shape index: {}]   ;;  %s6771_s7 = inlined_call_operand.hbm [shape: f32[2,16,16,128], index: 7, kind: output, shape index: {}]  }
   0x1   :  { %14 = vsyncpa [#allocation4 + $0x1], 0  ;;  %s5490_s24 = smov 0   ;;  %s5492_s25 = smov 0  }
   0x2   :  { %s5494_s26 = smov 0   ;;  %s5496_s27 = smov 0  }
   0x3   :  { %s5498_s28 = smov 0   ;;  %s5500_s29 = smov 0  }
   0x4   :  { %s5502_s30 = smov 0   ;;  %s5504_s8 = smov 0  }
   0x5 LB: > { %s4595_s9 = sadd.s32 4294967295, %s5443_s8   ;;  %s4596_s10 = sadd.s32 4294967294, %s5443_s8   ;;  %s5443_s8 = sphi %s5504_s8, %s20_s8   ;;  %s5439_s30 = sphi %s5502_s30, %s6835_s30   ;;  %s5435_s29 = sphi %s5500_s29, %s6834_s29   ;;  %s5431_s28 = sphi %s5498_s28, %s6833_s28   ;;  %s5427_s27 = sphi %s5496_s27, %s6832_s27   ;;  %s5423_s26 = sphi %s5494_s26, %s6831_s26   ;;  %s5419_s25 = sphi %s5492_s25, %s6830_s25   ;;  %s5415_s24 = sphi %s5490_s24, %s6829_s24  }
   0x6   : > { %s29_s11 = sadd.s32 1, %s5435_s29  ;;  %s32_s12 = sadd.s32 1, %s5439_s30 }
   0x7   : > { %p30_p0 = scmp.ge.s32.totalorder %s29_s11, 2  ;;  %p203_p1 = scmp.ne.s32.totalorder %s5423_s26, %s5419_s25 }
   0x8   : > { %p204_p2 = scmp.eq.s32.totalorder %s4595_s9, 3  ;;  %p209_p5 = scmp.ne.s32.totalorder %s5419_s25, %s5415_s24 }
   0x9   : > { %s6837_s11 = smov (%p30_p0, %s29_s11), 0  ;;  %s6839_s12 = smov (!%p30_p0, %s32_s12), %s5439_s30 }
   0xa   : > { %s189_s13 = ssub.s32 %s5435_s29, %s6837_s11  ;;  %p5541_p3 = por %p204_p2, %p203_p1 }
   0xb   : > { %p34_p4 = scmp.ge.s32.totalorder %s6839_s12, 2  ;;  %p210_p6 = scmp.eq.s32.totalorder %s4596_s10, 3 }
   0xc   : > { %p4599_p7 = scmp.ge.s32.totalorder %s5443_s8, 1  ;;  %p254_p9 = scmp.lt.s32.totalorder %s5443_s8, 5 }
   0xd   : > { %s6841_s12 = smov (%p34_p4, %s6839_s12), 0  ;;  %p5550_p8 = por %p210_p6, %p209_p5 }
   0xe   : > { %6774 = sst [smem:[#allocation6_spill]] %s6841_s12  ;;  %s188_s16 = ssub.s32 %s5439_s30, %s6841_s12 }
   0xf   : > { %s193_s17 = sadd.s32 1, %s5423_s26  ;;  %s190_s18 = sor.u32 %s189_s13, %s188_s16 }
  0x10   : > { %p255_p10 = pnand %p4599_p7, %p254_p9  ;;  %p191_p11 = scmp.eq.s32.totalorder %s190_s18, 0 }
  0x11   : > { %v5325_v0 = vld [vmem:[%s6765_s1] sm:$0xff] (!%p255_p10)   ;;  %p286_p12 = scmp.lt.s32.totalorder (!%p255_p10), %s5431_s28, 1  ;;  %v368_v1 = vlaneseq (!%p255_p10)  ;;  %v5326_v2 = vld [vmem:[%s6765_s1 + $0x8] sm:$0xff] (!%p255_p10)   ;;  %s4803_s10 = smul.u32 (!%p255_p10), 96, %s5427_s27  ;;  %v5327_v3 = vld [vmem:[%s6765_s1 + $0x10] sm:$0xff] (!%p255_p10)   ;;  %vm1570_vm0 = vcmask (!%p255_p10), 523264  }
  0x12   : > { %s5559_s19 = scalar_select %p191_p11, %s5423_s26, %s193_s17  }
  0x13   : > { %258 = sbr.rel (%p255_p10) target bundleno = 993 (0x3e1), region = 48  ;;  %4921 = vmatprep.subr.bf16.mxu0 (!%p255_p10), %v5325_v0  ;;  %v5573_v4 = vshrl.u32 (!%p255_p10), %v368_v1, 7  ;;  %v5445_v5 = vmov (!%p255_p10), 1966171168   ;;  %v5328_v7 = vld [vmem:[%s6765_s1 + $0x18] sm:$0xff] (!%p255_p10)   ;;  %s4804_s18 = sshll.u32 (!%p255_p10), %s5427_s27, 4 }
  0x14   : > { %4922 = vmatpush3.bf16.msra.mxu0 (!%p255_p10), %v5325_v0  ;;  %v366_v6 = vunpack.c.l.s4 (!%p255_p10), %v5445_v5  ;;  %s4799_s20 = sshll.u32 (!%p255_p10), %s5431_s28, 5 }
  0x15   : > { %4923 = vmatprep.subr.bf16.mxu0 (!%p255_p10), %v5326_v2  ;;  %vm2207_vm4 = vcmp.ge.s32.totalorder (!%p255_p10), %v5573_v4, 1  ;;  %s4514_s21 = sadd.s32 (!%p255_p10), %s4804_s18, %s4799_s20 }
  0x16   : > { %v367_v8 = vunpack.c.0.s8 (!%p255_p10), %v366_v6 }
  0x18   : > { %4924 = vmatpush3.bf16.msra.mxu0 (!%p255_p10), %v5326_v2  ;;  %v5586_v12 = vsub.s32 (!%p255_p10), %v367_v8, %v5573_v4 }
  0x19   : > { %4925 = vmatprep.subr.bf16.mxu0 (!%p255_p10), %v5327_v3 }
  0x1a   : > { %s287_s9 = scalar_select %p286_p12, %s5431_s28, 1 }
  0x1c   : > { %s5249_s17 = smul.u32 216, %s287_s9  ;;  %4926 = vmatpush3.bf16.msra.mxu0 %v5327_v3  ;;  %s4602_s9 = sshll.u32 %s5427_s27, 3 }
  0x1d   : > { %4927 = vmatprep.subr.bf16.mxu0 %v5328_v7  ;;  %s4800_s27 = sshll.u32 %s4514_s21, 7 }
  0x1e   : > { %s290_s23 = scalar_lea.vmem %s6764_s0, %s5249_s17 }
  0x1f   : > { %s5581_s12 = scalar_lea.vmem %s290_s23, %s4803_s10 }
  0x20   : > { %v4605_v9 = vld.sshfl [vmem:[%s5581_s12] sm:$0x33 pattern:$0x75316420]  ;;  %4928 = vmatpush3.bf16.msra.mxu0 %v5328_v7 }
  0x21   : > { %v4606_v10 = vld.sshfl [vmem:[%s5581_s12 + $0x4] sm:$0x33 pattern:$0x75316420]  ;;  %v364_v11 = vcombine.high %v4605_v9, %v4605_v9  ;;  %v371_v15 = vrot.slane %v4605_v9, %v5586_v12 }
  0x22   : > { %v388_v13 = vcombine.high %v4606_v10, %v4606_v10  ;;  %v4607_v14 = vld.sshfl [vmem:[%s5581_s12 + $0x8] sm:$0x1 pattern:$0x75316420]  ;;  %v395_v17 = vrot.slane %v4606_v10, %v5586_v12 }
  0x23   : > { %v378_v16 = vrot.slane %v364_v11, %v5586_v12  ;;  %v4608_v18 = vld.sshfl [vmem:[%s5581_s12 + $0xc] sm:$0x33 pattern:$0x75316420]  ;;  %v418_v21 = vrot.slane %v4607_v14, %v5586_v12 }
  0x24   : > { %v402_v19 = vrot.slane %v388_v13, %v5586_v12  ;;  %v4609_v20 = vld.sshfl [vmem:[%s5581_s12 + $0x10] sm:$0x33 pattern:$0x75316420]  ;;  %v426_v22 = vcombine.high %v4608_v18, %v4608_v18  ;;  %v433_v23 = vrot.slane %v4608_v18, %v5586_v12 }
  0x25   : > { %v992_v24 = vcombine.low %v371_v15, %v378_v16  ;;  %v4636_v25 = vcombine.high %v371_v15, %v378_v16  ;;  %v450_v26 = vcombine.high %v4609_v20, %v4609_v20  ;;  %v457_v27 = vrot.slane %v4609_v20, %v5586_v12  ;;  %v4610_v36 = vld.sshfl [vmem:[%s5581_s12 + $0x14] sm:$0x1 pattern:$0x75316420] }
  0x26   : > { %v994_v28 = vcombine.low %v395_v17, %v402_v19  ;;  %v4637_v29 = vcombine.high %v395_v17, %v402_v19  ;;  %v440_v30 = vrot.slane %v426_v22, %v5586_v12  ;;  %v441_v31 = vcombine.high %v433_v23, %v433_v23  ;;  %v4611_v41 = vld.sshfl [vmem:[%s5581_s12 + $0x18] sm:$0x33 pattern:$0x75316420] }
  0x27   : > { %v1002_v32 = vrot.slane %v992_v24, %v5586_v12  ;;  %v1009_v33 = vrot.slane %v4636_v25, %v5586_v12  ;;  %v464_v34 = vrot.slane %v450_v26, %v5586_v12  ;;  %v465_v35 = vcombine.high %v457_v27, %v457_v27  ;;  %v4612_v45 = vld.sshfl [vmem:[%s5581_s12 + $0x1c] sm:$0x33 pattern:$0x75316420] }
  0x28   : > { %v1016_v37 = vrot.slane %v994_v28, %v5586_v12  ;;  %v1023_v38 = vrot.slane %v4637_v29, %v5586_v12  ;;  %v442_v39 = vcombine.high %v440_v30, %v440_v30  ;;  %v1041_v40 = vcombine.low %v418_v21, %v433_v23  ;;  %v4613_v55 = vld.sshfl [vmem:[%s5581_s12 + $0x20] sm:$0x1 pattern:$0x75316420] }
  0x29   : > { %v1024_v42 = vcombine.low %v1002_v32, %v1009_v33  ;;  %v1042_v43 = vcombine.low %v440_v30, %v441_v31  ;;  %v1044_v44 = vcombine.low %v464_v34, %v465_v35  ;;  %v466_v46 = vcombine.high %v464_v34, %v464_v34  ;;  %v4614_v0 = vld.sshfl [vmem:[%s5581_s12 + $0x24] sm:$0x33 pattern:$0x75316420] }
  0x2a   : > { %v1025_v47 = vcombine.low %v1016_v37, %v1023_v38  ;;  %v1043_v48 = vcombine.low %v442_v39, %v457_v27  ;;  %v1051_v49 = vrot.slane %v1041_v40, %v5586_v12  ;;  %v480_v50 = vrot.slane %v4610_v36, %v5586_v12  ;;  %v4615_v5 = vld.sshfl [vmem:[%s5581_s12 + $0x28] sm:$0x33 pattern:$0x75316420] }
  0x2b   : > { %v1032_v51 = vrot.slane %v1024_v42, %v5586_v12  ;;  %v1058_v52 = vrot.slane %v1042_v43, %v5586_v12  ;;  %v1072_v53 = vrot.slane %v1044_v44, %v5586_v12  ;;  %v488_v54 = vcombine.high %v4611_v41, %v4611_v41  ;;  %v4616_v24 = vld.sshfl [vmem:[%s5581_s12 + $0x2c] sm:$0x1 pattern:$0x75316420] }
  0x2c   : > { %v1039_v56 = vrot.slane %v1025_v47, %v5586_v12  ;;  %v1065_v57 = vrot.slane %v1043_v48, %v5586_v12  ;;  %v495_v58 = vrot.slane %v4611_v41, %v5586_v12  ;;  %v512_v59 = vcombine.high %v4612_v45, %v4612_v45  ;;  %v4617_v28 = vld.sshfl [vmem:[%s5581_s12 + $0x30] sm:$0x33 pattern:$0x75316420] }
  0x2d   : > { %v1073_v60 = vcombine.low %v1051_v49, %v1058_v52  ;;  %v502_v61 = vrot.slane %v488_v54, %v5586_v12  ;;  %v519_v62 = vrot.slane %v4612_v45, %v5586_v12  ;;  %v1090_v63 = vcombine.low %v466_v46, %v480_v50  ;;  %v4618_v38 = vld.sshfl [vmem:[%s5581_s12 + $0x34] sm:$0x33 pattern:$0x75316420] }
  0x2e   : > { %v1040_v1 = vcombine.low %v1032_v51, %v1039_v56  ;;  %v1074_v2 = vcombine.low %v1065_v57, %v1072_v53  ;;  %v526_v3 = vrot.slane %v512_v59, %v5586_v12  ;;  %v542_v6 = vrot.slane %v4613_v55, %v5586_v12  ;;  %v4619_v47 = vld.sshfl [vmem:[%s5581_s12 + $0x38] sm:$0x1 pattern:$0x75316420] }
  0x2f   : > { %v1081_v7 = vrot.slane %v1073_v60, %v5586_v12  ;;  %v1091_v8 = vcombine.low %v495_v58, %v502_v61  ;;  %v4638_v9 = vcombine.high %v495_v58, %v502_v61  ;;  %v1100_v10 = vrot.slane %v1090_v63, %v5586_v12  ;;  %v4620_v51 = vld.sshfl [vmem:[%s5581_s12 + $0x3c] sm:$0x33 pattern:$0x75316420] }
  0x30   : > { %4929 = vmatprep.mubr.msk.bf16.mxu0 %vm1570_vm0, %v1040_v1  ;;  %v1088_v11 = vrot.slane %v1074_v2, %v5586_v12  ;;  %v1093_v13 = vcombine.low %v519_v62, %v526_v3  ;;  %v550_v14 = vcombine.high %v4614_v0, %v4614_v0  ;;  %v557_v15 = vrot.slane %v4614_v0, %v5586_v12 }
  0x31   : > { %v1107_v16 = vrot.slane %v1091_v8, %v5586_v12  ;;  %v1114_v17 = vrot.slane %v4638_v9, %v5586_v12  ;;  %v581_v18 = vrot.slane %v4615_v5, %v5586_v12  ;;  %v4639_v19 = vcombine.high %v519_v62, %v526_v3 }
  0x32   : > { %v1089_v20 = vcombine.low %v1081_v7, %v1088_v11  ;;  %v1121_v21 = vrot.slane %v1093_v13, %v5586_v12  ;;  %v564_v22 = vrot.slane %v550_v14, %v5586_v12  ;;  %v565_v23 = vcombine.high %v557_v15, %v557_v15  ;;  %v4622_v11 = vld.sshfl [vmem:[%s5581_s12 + $0x44] sm:$0x1 pattern:$0x75316420] }
  0x33   : > { %v1122_v25 = vcombine.low %v1100_v10, %v1107_v16  ;;  %v1140_v26 = vcombine.low %v542_v6, %v557_v15  ;;  %v1149_v27 = vrot.slane %v4639_v19, %v5586_v12  ;;  %v574_v29 = vcombine.high %v4615_v5, %v4615_v5  ;;  %v4621_v6 = vld.sshfl [vmem:[%s5581_s12 + $0x40] sm:$0x33 pattern:$0x75316420] }
  0x34   : > { %4930 = vmatmul.mubr.msk.bf16.vlgmr.msra.gmra.mrb[0].mxu0 %vm1570_vm0, %v1089_v20  ;;  %v1123_v30 = vcombine.low %v1114_v17, %v1121_v21  ;;  %v566_v31 = vcombine.high %v564_v22, %v564_v22  ;;  %v1141_v32 = vcombine.low %v564_v22, %v565_v23  ;;  %v589_v33 = vcombine.high %v581_v18, %v581_v18  ;;  %v4623_v17 = vld.sshfl [vmem:[%s5581_s12 + $0x48] sm:$0x33 pattern:$0x75316420] }
  0x35   : > { %v1130_v34 = vrot.slane %v1122_v25, %v5586_v12  ;;  %v1156_v35 = vrot.slane %v1140_v26, %v5586_v12  ;;  %v588_v36 = vrot.slane %v574_v29, %v5586_v12  ;;  %v604_v37 = vrot.slane %v4616_v24, %v5586_v12 }
  0x36   : > { %v1137_v39 = vrot.slane %v1123_v30, %v5586_v12  ;;  %v1142_v40 = vcombine.low %v566_v31, %v581_v18  ;;  %v1163_v41 = vrot.slane %v1141_v32, %v5586_v12  ;;  %v612_v42 = vcombine.high %v4617_v28, %v4617_v28  ;;  %v4624_v30 = vld.sshfl [vmem:[%s5581_s12 + $0x4c] sm:$0x33 pattern:$0x75316420] }
  0x37   : > { %v1171_v43 = vcombine.low %v1149_v27, %v1156_v35  ;;  %v590_v44 = vcombine.high %v588_v36, %v588_v36  ;;  %v619_v45 = vrot.slane %v4617_v28, %v5586_v12  ;;  %v1188_v46 = vcombine.low %v588_v36, %v589_v33  ;;  %v4625_v35 = vld.sshfl [vmem:[%s5581_s12 + $0x50] sm:$0x1 pattern:$0x75316420] }
  0x38   : > { %v1138_v48 = vcombine.low %v1130_v34, %v1137_v39  ;;  %v1170_v49 = vrot.slane %v1142_v40, %v5586_v12  ;;  %v626_v50 = vrot.slane %v612_v42, %v5586_v12  ;;  %v636_v52 = vcombine.high %v4618_v38, %v4618_v38  ;;  %v4626_v40 = vld.sshfl [vmem:[%s5581_s12 + $0x54] sm:$0x33 pattern:$0x75316420] }
  0x39   : > { %v1179_v53 = vrot.slane %v1171_v43, %v5586_v12  ;;  %v1189_v54 = vcombine.low %v590_v44, %v604_v37  ;;  %v1198_v55 = vrot.slane %v1188_v46, %v5586_v12  ;;  %v643_v56 = vrot.slane %v4618_v38, %v5586_v12 }
  0x3a   : > { %4933 = vmatprep.mubr.msk.bf16.mxu0 %vm1570_vm0, %v1138_v48  ;;  %v1172_v57 = vcombine.low %v1163_v41, %v1170_v49  ;;  %v1190_v58 = vcombine.low %v619_v45, %v626_v50  ;;  %v4640_v59 = vcombine.high %v619_v45, %v626_v50  ;;  %v650_v60 = vrot.slane %v636_v52, %v5586_v12 }
  0x3b   : > { %v1205_v61 = vrot.slane %v1189_v54, %v5586_v12  ;;  %v666_v62 = vrot.slane %v4619_v47, %v5586_v12  ;;  %v674_v63 = vcombine.high %v4620_v51, %v4620_v51  ;;  %v681_v0 = vrot.slane %v4620_v51, %v5586_v12 }
  0x3c   : > { %v1186_v1 = vrot.slane %v1172_v57, %v5586_v12  ;;  %v1212_v2 = vrot.slane %v1190_v58, %v5586_v12  ;;  %v1219_v3 = vrot.slane %v4640_v59, %v5586_v12  ;;  %v1237_v5 = vcombine.low %v643_v56, %v650_v60 }
  0x3d   : > { %v1220_v7 = vcombine.low %v1198_v55, %v1205_v61  ;;  %v688_v8 = vrot.slane %v674_v63, %v5586_v12  ;;  %v689_v9 = vcombine.high %v681_v0, %v681_v0  ;;  %v4641_v10 = vcombine.high %v643_v56, %v650_v60  ;;  %v4627_v61 = vld.sshfl [vmem:[%s5581_s12 + $0x58] sm:$0x33 pattern:$0x75316420] }
  0x3e   : > { %v1187_v13 = vcombine.low %v1179_v53, %v1186_v1  ;;  %v1221_v14 = vcombine.low %v1212_v2, %v1219_v3  ;;  %v1239_v15 = vcombine.low %v666_v62, %v681_v0  ;;  %v1247_v16 = vrot.slane %v1237_v5, %v5586_v12  ;;  %v4628_v0 = vld.sshfl [vmem:[%s5581_s12 + $0x5c] sm:$0x1 pattern:$0x75316420] }
  0x3f   : > { %v1228_v18 = vrot.slane %v1220_v7, %v5586_v12  ;;  %v1240_v19 = vcombine.low %v688_v8, %v689_v9  ;;  %v1254_v20 = vrot.slane %v4641_v10, %v5586_v12  ;;  %v690_v21 = vcombine.high %v688_v8, %v688_v8 }
  0x40   : > { %4934 = vmatmul.mubr.msk.bf16.gmra.mrb[4].mxu0 %vm1570_vm0, %v1187_v13  ;;  %v1235_v22 = vrot.slane %v1221_v14, %v5586_v12  ;;  %v1261_v23 = vrot.slane %v1239_v15, %v5586_v12  ;;  %v698_v24 = vcombine.high %v4621_v6, %v4621_v6  ;;  %v705_v25 = vrot.slane %v4621_v6, %v5586_v12  ;;  %v4629_v13 = vld.sshfl [vmem:[%s5581_s12 + $0x60] sm:$0x33 pattern:$0x75316420] }
  0x41   : > { %v1268_v26 = vrot.slane %v1240_v19, %v5586_v12  ;;  %v1269_v27 = vcombine.low %v1247_v16, %v1254_v20  ;;  %v728_v28 = vrot.slane %v4622_v11, %v5586_v12  ;;  %v736_v29 = vcombine.high %v4623_v17, %v4623_v17 }
  0x42   : > { %v1236_v31 = vcombine.low %v1228_v18, %v1235_v22  ;;  %v712_v32 = vrot.slane %v698_v24, %v5586_v12  ;;  %v713_v33 = vcombine.high %v705_v25, %v705_v25  ;;  %v743_v34 = vrot.slane %v4623_v17, %v5586_v12  ;;  %v4630_v22 = vld.sshfl [vmem:[%s5581_s12 + $0x64] sm:$0x33 pattern:$0x75316420] }
  0x43   : > { %v1270_v36 = vcombine.low %v1261_v23, %v1268_v26  ;;  %v1277_v37 = vrot.slane %v1269_v27, %v5586_v12  ;;  %v750_v38 = vrot.slane %v736_v29, %v5586_v12  ;;  %v1286_v39 = vcombine.low %v690_v21, %v705_v25 }
  0x44   : > { %4937 = vmatprep.mubr.msk.bf16.mxu0 %vm1570_vm0, %v1236_v31  ;;  %v714_v41 = vcombine.high %v712_v32, %v712_v32  ;;  %v1287_v42 = vcombine.low %v712_v32, %v713_v33  ;;  %v760_v43 = vcombine.high %v4624_v30, %v4624_v30  ;;  %v767_v44 = vrot.slane %v4624_v30, %v5586_v12  ;;  %v4631_v31 = vld.sshfl [vmem:[%s5581_s12 + $0x68] sm:$0x1 pattern:$0x75316420] }
  0x45   : > { %v1284_v45 = vrot.slane %v1270_v36, %v5586_v12  ;;  %v1289_v46 = vcombine.low %v743_v34, %v750_v38  ;;  %v1296_v47 = vrot.slane %v1286_v39, %v5586_v12  ;;  %v790_v48 = vrot.slane %v4625_v35, %v5586_v12  ;;  %v4632_v36 = vld.sshfl [vmem:[%s5581_s12 + $0x6c] sm:$0x33 pattern:$0x75316420] }
  0x46   : > { %v1288_v49 = vcombine.low %v714_v41, %v728_v28  ;;  %v1303_v50 = vrot.slane %v1287_v42, %v5586_v12  ;;  %v774_v51 = vrot.slane %v760_v43, %v5586_v12  ;;  %v805_v52 = vrot.slane %v4626_v40, %v5586_v12 }
  0x47   : > { %v1285_v53 = vcombine.low %v1277_v37, %v1284_v45  ;;  %v1317_v54 = vrot.slane %v1289_v46, %v5586_v12  ;;  %v4642_v55 = vcombine.high %v743_v34, %v750_v38  ;;  %v798_v56 = vcombine.high %v4626_v40, %v4626_v40 }
  0x48   : > { %v1310_v57 = vrot.slane %v1288_v49, %v5586_v12  ;;  %v1318_v58 = vcombine.low %v1296_v47, %v1303_v50  ;;  %v1336_v59 = vcombine.low %v767_v44, %v774_v51  ;;  %v4643_v60 = vcombine.high %v767_v44, %v774_v51  ;;  %v4633_v44 = vld.sshfl [vmem:[%s5581_s12 + $0x70] sm:$0x33 pattern:$0x75316420] }
  0x49   : > { %4938 = vmatmul.mubr.msk.bf16.gmra.mrb[8].mxu0 %vm1570_vm0, %v1285_v53  ;;  %v1338_v62 = vcombine.low %v790_v48, %v805_v52  ;;  %v1345_v63 = vrot.slane %v4642_v55, %v5586_v12  ;;  %v812_v1 = vrot.slane %v798_v56, %v5586_v12  ;;  %v813_v2 = vcombine.high %v805_v52, %v805_v52 }
  0x4a   : > { %v1319_v3 = vcombine.low %v1310_v57, %v1317_v54  ;;  %v1326_v5 = vrot.slane %v1318_v58, %v5586_v12  ;;  %v1352_v6 = vrot.slane %v1336_v59, %v5586_v12  ;;  %v1359_v7 = vrot.slane %v4643_v60, %v5586_v12 }
  0x4b   : > { %v1366_v8 = vrot.slane %v1338_v62, %v5586_v12  ;;  %v814_v9 = vcombine.high %v812_v1, %v812_v1  ;;  %v822_v10 = vcombine.high %v4627_v61, %v4627_v61  ;;  %v829_v11 = vrot.slane %v4627_v61, %v5586_v12 }
  0x4c   : > { %v1333_v14 = vrot.slane %v1319_v3, %v5586_v12  ;;  %v1367_v15 = vcombine.low %v1345_v63, %v1352_v6  ;;  %v852_v16 = vrot.slane %v4628_v0, %v5586_v12  ;;  %v1384_v17 = vcombine.low %v812_v1, %v813_v2  ;;  %v4634_v2 = vld.sshfl [vmem:[%s5581_s12 + $0x74] sm:$0x1 pattern:$0x75316420]  ;;  %s6703_s12 = scalar_lea.hbm %s6771_s7, %s4800_s27 }
  0x4d   : > { %v1368_v18 = vcombine.low %v1359_v7, %v1366_v8  ;;  %v836_v19 = vrot.slane %v822_v10, %v5586_v12  ;;  %v837_v20 = vcombine.high %v829_v11, %v829_v11  ;;  %v1385_v21 = vcombine.low %v814_v9, %v829_v11 }
  0x4e   : > { %v1334_v23 = vcombine.low %v1326_v5, %v1333_v14  ;;  %v1375_v24 = vrot.slane %v1367_v15, %v5586_v12  ;;  %v1394_v25 = vrot.slane %v1384_v17, %v5586_v12  ;;  %v860_v26 = vcombine.high %v4629_v13, %v4629_v13 }
  0x4f   : > { %v1382_v27 = vrot.slane %v1368_v18, %v5586_v12  ;;  %v838_v28 = vcombine.high %v836_v19, %v836_v19  ;;  %v1386_v29 = vcombine.low %v836_v19, %v837_v20  ;;  %v1401_v30 = vrot.slane %v1385_v21, %v5586_v12 }
  0x50   : > { %4941 = vmatprep.mubr.msk.bf16.mxu0 %vm1570_vm0, %v1334_v23  ;;  %v867_v32 = vrot.slane %v4629_v13, %v5586_v12  ;;  %v874_v33 = vrot.slane %v860_v26, %v5586_v12  ;;  %v884_v34 = vcombine.high %v4630_v22, %v4630_v22  ;;  %v891_v35 = vrot.slane %v4630_v22, %v5586_v12 }
  0x51   : > { %v1383_v37 = vcombine.low %v1375_v24, %v1382_v27  ;;  %v1387_v38 = vcombine.low %v838_v28, %v852_v16  ;;  %v1408_v39 = vrot.slane %v1386_v29, %v5586_v12  ;;  %v1416_v40 = vcombine.low %v1394_v25, %v1401_v30  ;;  %v5329_v28 = vld [vmem:[%s6766_s2 + $0x10] sm:$0xff]   ;;  %v5330_v29 = vld [vmem:[%s6766_s2 + $0x18] sm:$0xff]   ;;  %v5332_v30 = vld [vmem:[%s6766_s2 + $0x48] sm:$0xff]  }
  0x52   : > { %v898_v41 = vrot.slane %v884_v34, %v5586_v12  ;;  %v1433_v42 = vcombine.low %v867_v32, %v874_v33  ;;  %v4644_v43 = vcombine.high %v867_v32, %v874_v33  ;;  %v914_v45 = vrot.slane %v4631_v31, %v5586_v12  ;;  %4953 = vmatprep.subr.bf16.mxu1 %v5329_v28  ;;  %v5761_v31 = vld [vmem:[%s6766_s2] sm:$0xff]   ;;  %v5767_v32 = vld [vmem:[%s6766_s2 + $0x30] sm:$0xff]  }
  0x53   : > { %4942 = vmatmul.mubr.msk.bf16.gmra.mrb[12].mxu0 %vm1570_vm0, %v1383_v37  ;;  %v1415_v46 = vrot.slane %v1387_v38, %v5586_v12  ;;  %v1424_v47 = vrot.slane %v1416_v40, %v5586_v12  ;;  %v922_v48 = vcombine.high %v4632_v36, %v4632_v36  ;;  %v929_v49 = vrot.slane %v4632_v36, %v5586_v12  ;;  %v5774_v36 = vld [vmem:[%s6768_s4] ss:$0 sm:$0xff] }
  0x54   : > { %v1435_v50 = vcombine.low %v891_v35, %v898_v41  ;;  %v4645_v51 = vcombine.high %v891_v35, %v898_v41  ;;  %v1443_v52 = vrot.slane %v1433_v42, %v5586_v12  ;;  %v1450_v53 = vrot.slane %v4644_v43, %v5586_v12  ;;  %4954 = vmatpush3.bf16.msra.mxu1 %v5329_v28 }
  0x55   : > { %v1417_v54 = vcombine.low %v1408_v39, %v1415_v46  ;;  %v936_v55 = vrot.slane %v922_v48, %v5586_v12  ;;  %v937_v56 = vcombine.high %v929_v49, %v929_v49  ;;  %v946_v57 = vcombine.high %v4633_v44, %v4633_v44  ;;  %4955 = vmatprep.subr.bf16.mxu1 %v5330_v29 }
  0x56   : > { %v1457_v58 = vrot.slane %v1435_v50, %v5586_v12  ;;  %v1464_v59 = vrot.slane %v4645_v51, %v5586_v12  ;;  %v1465_v60 = vcombine.low %v1443_v52, %v1450_v53  ;;  %v953_v61 = vrot.slane %v4633_v44, %v5586_v12 }
  0x57   : > { %v1431_v62 = vrot.slane %v1417_v54, %v5586_v12  ;;  %v938_v63 = vcombine.high %v936_v55, %v936_v55  ;;  %v960_v0 = vrot.slane %v946_v57, %v5586_v12  ;;  %v1482_v1 = vcombine.low %v914_v45, %v929_v49 }
  0x58   : > { %v1466_v3 = vcombine.low %v1457_v58, %v1464_v59  ;;  %v1473_v5 = vrot.slane %v1465_v60, %v5586_v12  ;;  %v961_v6 = vcombine.high %v953_v61, %v953_v61  ;;  %v1483_v7 = vcombine.low %v936_v55, %v937_v56  ;;  %4956 = vmatpush3.bf16.msra.mxu1 %v5330_v29 }
  0x59   : > { %v1432_v8 = vcombine.low %v1424_v47, %v1431_v62  ;;  %v1484_v9 = vcombine.low %v938_v63, %v953_v61  ;;  %v1492_v10 = vrot.slane %v1482_v1, %v5586_v12  ;;  %v962_v11 = vcombine.high %v960_v0, %v960_v0  ;;  %4973 = vmatprep.subr.bf16.mxu1 %v5761_v31 }
  0x5a   : > { %v1480_v13 = vrot.slane %v1466_v3, %v5586_v12  ;;  %v1485_v14 = vcombine.low %v960_v0, %v961_v6  ;;  %v1499_v15 = vrot.slane %v1483_v7, %v5586_v12  ;;  %v976_v16 = vrot.slane %v4634_v2, %v5586_v12 }
  0x5b   : > { %4945 = vmatprep.mubr.msk.bf16.mxu0 %vm1570_vm0, %v1432_v8  ;;  %v1506_v17 = vrot.slane %v1484_v9, %v5586_v12  ;;  %v5446_v33 = vmov 1983009808   ;;  %v5776_v38 = vstv %s4602_s9  ;;  %v5779_v39 = vadd.s32 16, %v5573_v4  ;;  %s283_s9 = sand.u32 1, %s5419_s25  }
  0x5c   : > { %v1481_v18 = vcombine.low %v1473_v5, %v1480_v13  ;;  %v1513_v19 = vrot.slane %v1485_v14, %v5586_v12  ;;  %v1514_v20 = vcombine.low %v1492_v10, %v1499_v15  ;;  %v1531_v21 = vcombine.low %v962_v11, %v976_v16  ;;  %s4600_s16 = sshll.u32 %s283_s9, 7  ;;  %s6712_s10 = scalar_lea.sflag [#allocation4], %s283_s9 }
  0x5d   : > { %v1783_v34 = vunpack.c.l.s4 %v5446_v33  ;;  %vm2177_vm1 = vcmp.ge.s32.totalorder %v5776_v38, 1  ;;  %v5789_v47 = vadd.s32 1, %v5776_v38  ;;  %vm2187_vm2 = vcmp.le.s32.totalorder %v5776_v38, 16  ;;  %s6670_s17 = scalar_lea.vmem [#allocation3], %s4600_s16  ;;  %s5447_s16 = smov [#allocation3]  }
  0x5e   : > { %4946 = vmatmul.mubr.msk.bf16.gmra.mrb[16].mxu0 %vm1570_vm0, %v1481_v18  ;;  %v1515_v22 = vcombine.low %v1506_v17, %v1513_v19  ;;  %v1522_v23 = vrot.slane %v1514_v20, %v5586_v12  ;;  %v1538_v24 = vrot.slane %v1531_v21, %v5586_v12  ;;  %vm2242_vm3 = vcmp.le.s32.totalorder %v5779_v39, 16  ;;  %vm5815_vm9 = vmand %vm2177_vm1, %vm2187_vm2  ;;  %v5338_v39 = vld [vmem:[%s6766_s2 + $0x28] sm:$0xff]   ;;  %s4517_s28 = sshll.u32 %s6670_s17, 4  ;;  %s5353_s18 = sshll.u32 %s5447_s16, 4  ;;  %s6705_s28 = int_to_ptr.vmem [resolvable:$true] %s4517_s28  ;;  %s5354_s18 = int_to_ptr.vmem [resolvable:$false] %s5353_s18 }
  0x5f   : > { %v1784_v35 = vunpack.c.0.s8 %v1783_v34  ;;  %v5796_v54 = vadd.s32 2, %v5776_v38  ;;  %vm2178_vm5 = vcmp.ge.s32.totalorder %v5789_v47, 1  ;;  %vm2188_vm6 = vcmp.le.s32.totalorder %v5789_v47, 16  ;;  %vm2245_vm10 = vmand %vm5815_vm9, %vm2242_vm3  ;;  %s5349_s13 = scalar_lea.vmem %s6705_s28, 2048  ;;  %s5355_s20 = scalar_lea.vmem %s5354_s18, 4096 }
  0x60   : > { %v1529_v25 = vrot.slane %v1515_v22, %v5586_v12  ;;  %v1545_v27 = vrot.slane %v1538_v24, %v5586_v12  ;;  %v5331_v12 = vld [vmem:[%s6766_s2 + $0x40] sm:$0xff]   ;;  %v5808_v3 = vadd.s32 3, %v5776_v38  ;;  %v5822_v14 = vadd.s32 4, %v5776_v38  ;;  %vm5844_vm11 = vmand %vm5815_vm9, %vm2207_vm4  ;;  %p5350_p13 = scmp.ne.s32.totalorder %s6705_s28, %s5349_s13  ;;  %p5356_p2 = scmp.lt.s32.totalorder %s6705_s28, %s5354_s18 }
  0x61   : > { %5013 = vmatprep.subr.bf16.mxu0 %v5331_v12  ;;  %v5783_v41 = vsub.s32 %v1784_v35, %v5573_v4  ;;  %vm2179_vm7 = vcmp.ge.s32.totalorder %v5796_v54, 1  ;;  %vm2189_vm8 = vcmp.le.s32.totalorder %v5796_v54, 16  ;;  %v5827_v19 = vadd.s32 5, %v5776_v38  ;;  %vm5854_vm12 = vmand %vm2178_vm5, %vm2188_vm6  ;;  %p5357_p4 = scmp.lt.s32.totalorder %s5355_s20, %s5349_s13 }
  0x62   : > { %v1530_v26 = vcombine.low %v1522_v23, %v1529_v25  ;;  %5014 = vmatpush3.bf16.msra.mxu0 %v5331_v12  ;;  %vm5868_vm13 = vmand %vm2179_vm7, %vm2189_vm8  ;;  %vm2190_vm1 = vcmp.le.s32.totalorder %v5808_v3, 16  ;;  %vm2181_vm7 = vcmp.ge.s32.totalorder %v5822_v14, 1  ;;  %vm2191_vm8 = vcmp.le.s32.totalorder %v5822_v14, 16  ;;  %p5351_p0 = pnand %p5350_p13, %p5541_p3 }
  0x63   : > { %5015 = vmatprep.subr.bf16.mxu0 %v5332_v30  ;;  %vm5877_vm14 = vmand %vm5854_vm12, %vm2207_vm4  ;;  %p5358_p5 = por %p5357_p4, %p5356_p2 }
  0x64   : > { %4949 = vmatprep.mubr.msk.bf16.mxu0 %vm1570_vm0, %v1530_v26  ;;  %vm5891_vm15 = vmand %vm5868_vm13, %vm2242_vm3  ;;  %p5352_p1 = pneg %p5351_p0 }
  0x65   : > { %vm5938_vm2 = vmand %vm5868_vm13, %vm2207_vm4 }
  0x66   : > { %4950 = vmatmul.mubr.msk.bf16.gmra.mrb[20].mxu0 %vm1570_vm0, %v1545_v27  ;;  %vm2180_vm0 = vcmp.ge.s32.totalorder %v5808_v3, 1  ;;  %vm5952_vm5 = vmand %vm5854_vm12, %vm2242_vm3  ;;  %p5359_p6 = pnand %p5358_p5, %p5352_p1 }
  0x67   : > { %5016 = vmatpush3.bf16.msra.mxu0 %v5332_v30  ;;  %vm5960_vm6 = vmand %vm2180_vm0, %vm2190_vm1  ;;  %vm2827_vm0 = vsmask.f32 7424  ;;  %vm2941_vm1 = vcmask 261120  }
  0x68   : > { %5033 = vmatprep.subr.bf16.mxu0 %v5767_v32 }
 0x107   : > { %v4931_v37 = vpop.f32.mrb[0].mxu0 }
 0x108   : > { %v1650_v40 = vadd.f32 %v4931_v37, %v5774_v36  ;;  %v1641_v42 = vpop.f32.mrb[1].mxu0 }
 0x109   : > { %v1642_v43 = vadd.f32 %v5774_v36, %v1641_v42  ;;  %v4932_v44 = vpop.f32.mrb[2].mxu0 }
 0x10a   : > { %v1737_v45 = vmax.f32 %v1650_v40, 0.0  ;;  %v1653_v46 = vadd.f32 %v4932_v44, %v5774_v36  ;;  %v1644_v48 = vpop.f32.mrb[3].mxu0 }
 0x10b   : > { %v1735_v49 = vmax.f32 %v1642_v43, 0.0  ;;  %v1645_v50 = vadd.f32 %v5774_v36, %v1644_v48 }
 0x10c   : > { %v1815_v51 = vcombine.high %v1737_v45, %v1737_v45  ;;  %v1822_v52 = vrot.slane %v1737_v45, %v5783_v41  ;;  %v1738_v53 = vmax.f32 %v1653_v46, 0.0 }
 0x10d   : > { %v1781_v55 = vcombine.high %v1735_v49, %v1735_v49  ;;  %v1788_v56 = vrot.slane %v1735_v49, %v5783_v41  ;;  %v1736_v57 = vmax.f32 %v1645_v50, 0.0 }
 0x10e   : > { %v1829_v58 = vrot.slane %v1815_v51, %v5783_v41  ;;  %v1830_v59 = vcombine.high %v1822_v52, %v1822_v52  ;;  %v1832_v60 = vcombine.high %v1738_v53, %v1738_v53  ;;  %v1839_v63 = vrot.slane %v1738_v53, %v5783_v41 }
 0x10f   : > { %v1795_v61 = vrot.slane %v1781_v55, %v5783_v41  ;;  %v1796_v62 = vcombine.high %v1788_v56, %v1788_v56  ;;  %v1798_v0 = vcombine.high %v1736_v57, %v1736_v57  ;;  %v1805_v11 = vrot.slane %v1736_v57, %v5783_v41 }
 0x110   : > { %v2374_v1 = vcombine.low %v1830_v59, %v1829_v58  ;;  %v1831_v2 = vcombine.high %v1829_v58, %v1829_v58  ;;  %v1846_v7 = vrot.slane %v1832_v60, %v5783_v41  ;;  %v1847_v8 = vcombine.high %v1839_v63, %v1839_v63 }
 0x111   : > { %v1797_v5 = vcombine.high %v1795_v61, %v1795_v61  ;;  %v2333_v6 = vcombine.low %v1788_v56, %v1796_v62  ;;  %v1812_v13 = vrot.slane %v1798_v0, %v5783_v41  ;;  %v2373_v15 = vrot.slane %v1822_v52, %v5783_v41 }
 0x112   : > { %v2375_v10 = vcombine.low %v1831_v2, %v1839_v63  ;;  %v2382_v16 = vrot.slane %v2374_v1, %v5783_v41  ;;  %v1813_v21 = vcombine.high %v1805_v11, %v1805_v11  ;;  %v2391_v27 = vcombine.low %v1847_v8, %v1846_v7 }
 0x113   : > { %v2334_v17 = vcombine.low %v1795_v61, %v1797_v5  ;;  %v4935_v18 = vpop.f32.mrb[4].mxu0  ;;  %v1814_v22 = vcombine.high %v1812_v13, %v1812_v13  ;;  %v2341_v25 = vrot.slane %v2333_v6, %v5783_v41  ;;  %v2775_v44 = vsel %vm2245_vm10, %v2373_v15, 0.0 }
 0x114   : > { %v2389_v20 = vrot.slane %v2375_v10, %v5783_v41  ;;  %v1666_v23 = vadd.f32 %v4935_v18, %v5774_v36  ;;  %v1657_v24 = vpop.f32.mrb[5].mxu0  ;;  %v2350_v30 = vcombine.low %v1805_v11, %v1813_v21  ;;  %v1848_v52 = vcombine.high %v1846_v7, %v1846_v7 }
 0x115   : > { %v2348_v26 = vrot.slane %v2334_v17, %v5783_v41  ;;  %v1658_v28 = vadd.f32 %v5774_v36, %v1657_v24  ;;  %v4936_v29 = vpop.f32.mrb[6].mxu0  ;;  %v2351_v33 = vcombine.low %v1812_v13, %v1814_v22  ;;  %v2399_v56 = vrot.slane %v2391_v27, %v5783_v41 }
 0x116   : > { %v2390_v12 = vcombine.low %v2382_v16, %v2389_v20  ;;  %v1741_v34 = vmax.f32 %v1666_v23, 0.0  ;;  %v1660_v35 = vpop.f32.mrb[7].mxu0  ;;  %v1669_v42 = vadd.f32 %v4936_v29, %v5774_v36  ;;  %v2358_v46 = vrot.slane %v2350_v30, %v5783_v41 }
 0x117   : > { %v2349_v37 = vcombine.low %v2341_v25, %v2348_v26  ;;  %v1739_v40 = vmax.f32 %v1658_v28, 0.0  ;;  %v1661_v43 = vadd.f32 %v5774_v36, %v1660_v35  ;;  %v2365_v48 = vrot.slane %v2351_v33, %v5783_v41 }
 0x118   : > { %v1883_v49 = vcombine.high %v1741_v34, %v1741_v34  ;;  %v1890_v51 = vrot.slane %v1741_v34, %v5783_v41  ;;  %v1742_v59 = vmax.f32 %v1669_v42, 0.0  ;;  %v5898_v18 = vadd.s32 6, %v5776_v38 }
 0x119   : > { %v1849_v53 = vcombine.high %v1739_v40, %v1739_v40  ;;  %v1856_v55 = vrot.slane %v1739_v40, %v5783_v41  ;;  %v2366_v57 = vcombine.low %v2358_v46, %v2365_v48  ;;  %v2773_v60 = vsel %vm5844_vm11, %v2349_v37, 0.0 }
 0x11a   : > { %v1897_v58 = vrot.slane %v1883_v49, %v5783_v41  ;;  %v1740_v63 = vmax.f32 %v1661_v43, 0.0  ;;  %v1898_v54 = vcombine.high %v1890_v51, %v1890_v51  ;;  %v1900_v5 = vcombine.high %v1742_v59, %v1742_v59 }
 0x11b   : > { %v1863_v61 = vrot.slane %v1849_v53, %v5783_v41  ;;  %v2392_v62 = vcombine.low %v1848_v52, %v1856_v55  ;;  %v2774_v1 = vsel %vm5815_vm9, %v2366_v57, 0.0  ;;  %v1907_v9 = vrot.slane %v1742_v59, %v5783_v41  ;;  %vm5988_vm9 = vmand %vm5960_vm6, %vm2207_vm4 }
 0x11c   : > { %v1899_v2 = vcombine.high %v1897_v58, %v1897_v58  ;;  %v4939_v6 = vpop.f32.mrb[8].mxu0  ;;  %v5883_v7 = vpack.c.bf16 %v2774_v1, %v2773_v60  ;;  %v2455_v8 = vrot.slane %v1897_v58, %v5783_v41  ;;  %v1914_v16 = vrot.slane %v1900_v5, %v5783_v41 }
 0x11d   : > { %v1865_v10 = vcombine.high %v1863_v61, %v1863_v61  ;;  %v2406_v11 = vrot.slane %v2392_v62, %v5783_v41  ;;  %v1673_v13 = vpop.f32.mrb[9].mxu0  ;;  %v5901_v20 = vadd.s32 7, %v5776_v38  ;;  %v5903_v21 = vpack.c.bf16 %v2775_v44, %v2775_v44 }
 0x11e   : > { %v4940_v17 = vpop.f32.mrb[10].mxu0  ;;  %v2776_v22 = vsel %vm5877_vm14, %v2390_v12, 0.0  ;;  %v1864_v23 = vcombine.high %v1856_v55, %v1856_v55  ;;  %v2433_v26 = vcombine.low %v1890_v51, %v1898_v54  ;;  %v1915_v27 = vcombine.high %v1907_v9, %v1907_v9 }
 0x11f   : > { %v2407_v24 = vcombine.low %v2399_v56, %v2406_v11  ;;  %v1676_v25 = vpop.f32.mrb[11].mxu0  ;;  %v2456_v28 = vcombine.low %v1899_v2, %v1907_v9  ;;  %v1866_v29 = vcombine.high %v1740_v63, %v1740_v63  ;;  %v2781_v30 = vsel %vm5891_vm15, %v2455_v8, 0.0 }
 0x120   : > { %v2415_v33 = vcombine.low %v1863_v61, %v1865_v10  ;;  %v1873_v12 = vrot.slane %v1740_v63, %v5783_v41  ;;  %v2457_v37 = vcombine.low %v1915_v27, %v1914_v16  ;;  %v2414_v43 = vrot.slane %v1864_v23, %v5783_v41 }
 0x121   : > { %v2777_v34 = vsel %vm5854_vm12, %v2407_v24, 0.0  ;;  %v2464_v40 = vrot.slane %v2456_v28, %v5783_v41  ;;  %v1880_v42 = vrot.slane %v1866_v29, %v5783_v41  ;;  %v1682_v45 = vadd.f32 %v4939_v6, %v5774_v36  ;;  %vm6032_vm12 = vmand %vm2181_vm7, %vm2191_vm8 }
 0x122   : > { %v5914_v35 = vpack.c.bf16 %v2777_v34, %v2776_v22  ;;  %v1881_v44 = vcombine.high %v1873_v12, %v1873_v12  ;;  %v1674_v46 = vadd.f32 %v5774_v36, %v1673_v13  ;;  %v2471_v48 = vrot.slane %v2457_v37, %v5783_v41 }
 0x123   : > { %v1882_v49 = vcombine.high %v1880_v42, %v1880_v42  ;;  %v1685_v51 = vadd.f32 %v4940_v17, %v5774_v36  ;;  %v1677_v52 = vadd.f32 %v5774_v36, %v1676_v25  ;;  %v2423_v53 = vrot.slane %v2415_v33, %v5783_v41 }
 0x124   : > { %v2416_v55 = vcombine.low %v1873_v12, %v1881_v44  ;;  %v1745_v56 = vmax.f32 %v1682_v45, 0.0  ;;  %v1743_v57 = vmax.f32 %v1674_v46, 0.0  ;;  %v2447_v58 = vrot.slane %v2433_v26, %v5783_v41 }
 0x125   : > { %v5926_v59 = vcombine.low %v2464_v40, %v2471_v48  ;;  %v2432_v60 = vcombine.low %v1880_v42, %v1882_v49  ;;  %v1746_v61 = vmax.f32 %v1685_v51, 0.0  ;;  %v1916_v6 = vcombine.high %v1914_v16, %v1914_v16 }
 0x126   : > { %v4943_v62 = vpop.f32.mrb[12].mxu0  ;;  %v2430_v63 = vrot.slane %v2416_v55, %v5783_v41  ;;  %v1951_v0 = vcombine.high %v1745_v56, %v1745_v56  ;;  %v1958_v1 = vrot.slane %v1745_v56, %v5783_v41  ;;  %v1917_v54 = vcombine.high %v1743_v57, %v1743_v57 }
 0x127   : > { %v1689_v2 = vpop.f32.mrb[13].mxu0  ;;  %v2440_v5 = vrot.slane %v2432_v60, %v5783_v41  ;;  %v1924_v8 = vrot.slane %v1743_v57, %v5783_v41  ;;  %v1744_v10 = vmax.f32 %v1677_v52, 0.0  ;;  %v1968_v27 = vcombine.high %v1746_v61, %v1746_v61 }
 0x128   : > { %v5932_v11 = vpop.f32.mrb[14].mxu0  ;;  %v2431_v15 = vcombine.low %v2423_v53, %v2430_v63  ;;  %v1965_v9 = vrot.slane %v1951_v0, %v5783_v41  ;;  %v1966_v17 = vcombine.high %v1958_v1, %v1958_v1  ;;  %v5944_v22 = vrot.slane %v1917_v54, %v5783_v41 }
 0x129   : > { %v5946_v16 = vpop.f32.mrb[15].mxu0  ;;  %v2448_v24 = vcombine.low %v2440_v5, %v2447_v58  ;;  %v1932_v25 = vcombine.high %v1924_v8, %v1924_v8  ;;  %v2473_v26 = vcombine.low %v1916_v6, %v1924_v8  ;;  %v5965_v33 = vrot.slane %v1746_v61, %v5783_v41 }
 0x12a   : > { %v1967_v29 = vcombine.high %v1965_v9, %v1965_v9  ;;  %v2836_v50 = vshll.u32 %v5903_v21, 16  ;;  %v5971_v34 = vadd.s32 8, %v5776_v38  ;;  %v5973_v12 = vpack.c.bf16 %v2781_v30, %v2781_v30 }
 0x12b   : > { %v2779_v3 = vsel %vm5938_vm2, %v2431_v15, 0.0  ;;  %v2780_v37 = vsel %vm5868_vm13, %v2448_v24, 0.0  ;;  %v2474_v40 = vcombine.low %v1932_v25, %v5944_v22  ;;  %v2778_v42 = vsel %vm5952_vm5, %v2414_v43, 0.0  ;;  %vm6044_vm13 = vmand %vm6032_vm12, %vm2207_vm4 }
 0x12c   : > { %v5982_v44 = vpack.c.bf16 %v2780_v37, %v2779_v3  ;;  %v2514_v45 = vcombine.low %v1958_v1, %v1966_v17  ;;  %v2515_v46 = vcombine.low %v1965_v9, %v1967_v29  ;;  %v2481_v47 = vrot.slane %v2473_v26, %v5783_v41  ;;  %vm6070_vm2 = vmand %vm6032_vm12, %vm2242_vm3 }
 0x12d   : > { %v2488_v48 = vrot.slane %v2474_v40, %v5783_v41  ;;  %v1982_v49 = vrot.slane %v1968_v27, %v5783_v41  ;;  %v1934_v51 = vcombine.high %v1744_v10, %v1744_v10  ;;  %v1983_v43 = vcombine.high %v5965_v33, %v5965_v33 }
 0x12e   : > { %v1941_v52 = vrot.slane %v1744_v10, %v5783_v41  ;;  %v1698_v53 = vadd.f32 %v4943_v62, %v5774_v36  ;;  %v1690_v55 = vadd.f32 %v5774_v36, %v1689_v2  ;;  %v6000_v56 = vpack.c.bf16 %v2778_v42, %v2778_v42 }
 0x12f   : > { %v2529_v57 = vrot.slane %v2515_v46, %v5783_v41  ;;  %v2489_v58 = vcombine.low %v2481_v47, %v2488_v48  ;;  %v1948_v60 = vrot.slane %v1934_v51, %v5783_v41  ;;  %v2782_v61 = vsel %vm5988_vm9, %v5926_v59, 0.0 }
 0x130   : > { %v1949_v63 = vcombine.high %v1941_v52, %v1941_v52  ;;  %v1749_v0 = vmax.f32 %v1698_v53, 0.0  ;;  %vm2182_vm10 = vcmp.ge.s32.totalorder %v5827_v19, 1  ;;  %vm2192_vm11 = vcmp.le.s32.totalorder %v5827_v19, 16 }
 0x131   : > { %v2829_v62 = vshrl.u32 %v5883_v7, 16  ;;  %v6010_v1 = vpop.f32.mrb[16].mxu0  ;;  %v2522_v54 = vrot.slane %v2514_v45, %v5783_v41  ;;  %v2783_v2 = vsel %vm5960_vm6, %v2489_v58, 0.0  ;;  %v1950_v5 = vcombine.high %v1948_v60, %v1948_v60  ;;  %vm6080_vm5 = vmand %vm2182_vm10, %vm2192_vm11 }
 0x132   : > { %v1747_v6 = vmax.f32 %v1690_v55, 0.0  ;;  %v6015_v8 = vpop.f32.mrb[17].mxu0  ;;  %v6017_v59 = vpack.c.bf16 %v2783_v2, %v2782_v61  ;;  %v2538_v10 = vcombine.low %v1983_v43, %v1982_v49  ;;  %v2497_v13 = vcombine.low %v1941_v52, %v1949_v63  ;;  %vm6104_vm7 = vmand %vm6080_vm5, %vm2207_vm4 }
 0x133   : > { %v2019_v15 = vcombine.high %v1749_v0, %v1749_v0  ;;  %v6019_v9 = vpop.f32.mrb[18].mxu0  ;;  %v2530_v17 = vcombine.low %v2522_v54, %v2529_v57  ;;  %v2498_v23 = vcombine.low %v1948_v60, %v1950_v5  ;;  %v2026_v24 = vrot.slane %v1749_v0, %v5783_v41 }
 0x134   : > { %v1985_v25 = vcombine.high %v1747_v6, %v1747_v6  ;;  %v6022_v26 = vpop.f32.mrb[19].mxu0  ;;  %v1984_v29 = vcombine.high %v1982_v49, %v1982_v49  ;;  %v1992_v3 = vrot.slane %v1747_v6, %v5783_v41  ;;  %v1701_v37 = vadd.f32 %v5932_v11, %v5774_v36 }
 0x135   : > { %v2033_v27 = vrot.slane %v2019_v15, %v5783_v41  ;;  %v2505_v42 = vrot.slane %v2497_v13, %v5783_v41  ;;  %v2512_v45 = vrot.slane %v2498_v23, %v5783_v41  ;;  %v2034_v46 = vcombine.high %v2026_v24, %v2026_v24 }
 0x136   : > { %v1693_v30 = vadd.f32 %v5774_v36, %v5946_v16  ;;  %v1999_v47 = vrot.slane %v1985_v25, %v5783_v41  ;;  %v2539_v48 = vcombine.low %v1984_v29, %v1992_v3  ;;  %v1750_v49 = vmax.f32 %v1701_v37, 0.0 }
 0x137   : > { %v2035_v14 = vcombine.high %v2033_v27, %v2033_v27  ;;  %vm2183_vm14 = vcmp.ge.s32.totalorder %v5898_v18, 1  ;;  %vm2193_vm15 = vcmp.le.s32.totalorder %v5898_v18, 16  ;;  %v1933_v16 = vcombine.high %v5944_v22, %v5944_v22 }
 0x138   : > { %v2513_v51 = vcombine.low %v2505_v42, %v2512_v45  ;;  %v2000_v43 = vcombine.high %v1992_v3, %v1992_v3  ;;  %v1748_v52 = vmax.f32 %v1693_v30, 0.0  ;;  %v2537_v53 = vrot.slane %v5965_v33, %v5783_v41  ;;  %vm6124_vm8 = vmand %vm2183_vm14, %vm2193_vm15 }
 0x139   : > { %v2546_v55 = vrot.slane %v2538_v10, %v5783_v41  ;;  %v2786_v57 = vsel %vm6032_vm12, %v2530_v17, 0.0  ;;  %v2553_v58 = vrot.slane %v2539_v48, %v5783_v41  ;;  %v6059_v60 = vpop.f32.mrb[20].mxu0  ;;  %v2596_v61 = vcombine.low %v2033_v27, %v2035_v14  ;;  %vm6134_vm9 = vmand %vm6124_vm8, %vm2207_vm4 }
 0x13a   : > { %v2785_v22 = vsel %vm6044_vm13, %v2513_v51, 0.0  ;;  %v2043_v63 = vrot.slane %v1750_v49, %v5783_v41  ;;  %v2002_v0 = vcombine.high %v1748_v52, %v1748_v52  ;;  %v6064_v54 = vpop.f32.mrb[21].mxu0  ;;  %v2580_v5 = vcombine.low %v2026_v24, %v2034_v46  ;;  %vm6191_vm14 = vmand %vm6124_vm8, %vm2242_vm3 }
 0x13b   : > { %v6074_v2 = vpack.c.bf16 %v2786_v57, %v2785_v22  ;;  %v2554_v6 = vcombine.low %v2546_v55, %v2553_v58  ;;  %v2001_v10 = vcombine.high %v1999_v47, %v1999_v47  ;;  %v4952_v13 = vpop.f32.mrb[22].mxu0  ;;  %v2555_v17 = vcombine.low %v2000_v43, %v1999_v47  ;;  %vm6202_vm15 = vmand %vm6080_vm5, %vm2242_vm3 }
 0x13c   : > { %v2036_v23 = vcombine.high %v1750_v49, %v1750_v49  ;;  %v2051_v25 = vcombine.high %v2043_v63, %v2043_v63  ;;  %v2016_v27 = vrot.slane %v2002_v0, %v5783_v41  ;;  %v6085_v29 = vpop.f32.mrb[23].mxu0  ;;  %v6088_v24 = vrot.slane %v1933_v16, %v5783_v41 }
 0x13d   : > { %v2009_v3 = vrot.slane %v1748_v52, %v5783_v41  ;;  %v2831_v37 = vshll.u32 %v5883_v7, 16  ;;  %v1714_v19 = vadd.f32 %v6010_v1, %v5774_v36  ;;  %v6096_v40 = vsel %vm6070_vm2, %v2537_v53, 0.0 }
 0x13e   : > { %v2604_v42 = vrot.slane %v2596_v61, %v5783_v41  ;;  %v2597_v45 = vcombine.low %v2043_v63, %v2051_v25  ;;  %v2018_v46 = vcombine.high %v2016_v27, %v2016_v27  ;;  %v2594_v30 = vrot.slane %v2580_v5, %v5783_v41 }
 0x13f   : > { %v2556_v14 = vcombine.low %v2001_v10, %v2009_v3  ;;  %v2833_v1 = vrot.slane %v2831_v37, 1  ;;  %v1753_v47 = vmax.f32 %v1714_v19, 0.0  ;;  %v2563_v48 = vrot.slane %v2555_v17, %v5783_v41 }
 0x140   : > { %v6110_v49 = vrot.slane %v2036_v23, %v5783_v41  ;;  %v2611_v16 = vrot.slane %v2597_v45, %v5783_v41  ;;  %v2579_v51 = vcombine.low %v2016_v27, %v2018_v46  ;;  %v2838_v53 = vrot.slane %v2836_v50, 1 }
 0x141   : > { %v2570_v43 = vrot.slane %v2556_v14, %v5783_v41  ;;  %v2834_v52 = vor.u32 %v2833_v1, %v2829_v62  ;;  %v2087_v55 = vcombine.high %v1753_v47, %v1753_v47  ;;  %v2788_v57 = vsel %vm6104_vm7, %v2554_v6, 0.0  ;;  %vm6236_vm7 = vmand %vm5960_vm6, %vm2242_vm3 }
 0x142   : > { %v2612_v22 = vcombine.low %v2604_v42, %v2611_v16  ;;  %v2587_v61 = vrot.slane %v2579_v51, %v5783_v41  ;;  %v2094_v62 = vrot.slane %v1753_v47, %v5783_v41  ;;  %v2017_v63 = vcombine.high %v2009_v3, %v2009_v3 }
 0x143   : > { %v2571_v0 = vcombine.low %v2563_v48, %v2570_v43  ;;  %v2839_v18 = vsel %vm2827_vm0, %v2834_v52, %v2838_v53  ;;  %v2101_v33 = vrot.slane %v2087_v55, %v5783_v41  ;;  %v2841_v10 = vshrl.u32 %v5914_v35, 16  ;;  %v5334_v52 = vld [vmem:[%s6766_s2 + $0x8] sm:$0xff]  }
 0x144   : > { %v2595_v5 = vcombine.low %v2587_v61, %v2594_v30  ;;  %4957 = vmatprep.mubr.msk.bf16.mxu1 %vm2941_vm1, %v2839_v18  ;;  %v2102_v6 = vcombine.high %v2094_v62, %v2094_v62  ;;  %v2843_v13 = vshll.u32 %v5914_v35, 16  ;;  %v2848_v25 = vshll.u32 %v6000_v56, 16 }
 0x145   : > { %v2789_v17 = vsel %vm6080_vm5, %v2571_v0, 0.0  ;;  %v2103_v23 = vcombine.high %v2101_v33, %v2101_v33  ;;  %v1706_v27 = vadd.f32 %v5774_v36, %v6015_v8  ;;  %vm2184_vm10 = vcmp.ge.s32.totalorder %v5901_v20, 1 }
 0x146   : > { %vm2194_vm11 = vcmp.le.s32.totalorder %v5901_v20, 16  ;;  %v2792_v3 = vsel %vm6124_vm8, %v2612_v22, 0.0  ;;  %v2791_v37 = vsel %vm6134_vm9, %v2595_v5, 0.0  ;;  %v6154_v19 = vpack.c.bf16 %v2789_v17, %v2788_v57 }
 0x147   : > { %v2845_v42 = vrot.slane %v2843_v13, 1  ;;  %vm2185_vm12 = vcmp.ge.s32.totalorder %v5971_v34, 1  ;;  %vm2195_vm13 = vcmp.le.s32.totalorder %v5971_v34, 16  ;;  %v2619_v8 = vrot.slane %v6110_v49, %v5783_v41  ;;  %vm6212_vm2 = vmand %vm2184_vm10, %vm2194_vm11 }
 0x148   : > { %v6160_v45 = vpack.c.bf16 %v2792_v3, %v2791_v37  ;;  %v2662_v46 = vcombine.low %v2101_v33, %v2103_v23  ;;  %v1751_v30 = vmax.f32 %v1706_v27, 0.0  ;;  %v2578_v11 = vrot.slane %v2017_v63, %v5783_v41  ;;  %vm6223_vm5 = vmand %vm2185_vm12, %vm2195_vm13 }
 0x149   : > { %v2846_v14 = vor.u32 %v2845_v42, %v2841_v10  ;;  %v2850_v1 = vrot.slane %v2848_v25, 1  ;;  %v1717_v47 = vadd.f32 %v6019_v9, %v5774_v36  ;;  %v2661_v48 = vcombine.low %v2094_v62, %v2102_v6  ;;  %v6185_v10 = vld [vmem:[%s6766_s2 + $0x20] sm:$0xff]   ;;  %vm6246_vm8 = vmand %vm6212_vm2, %vm2207_vm4 }
 0x14a   : > { %v2053_v16 = vcombine.high %v1751_v30, %v1751_v30  ;;  %v2060_v51 = vrot.slane %v1751_v30, %v5783_v41  ;;  %v1709_v43 = vadd.f32 %v5774_v36, %v6022_v26  ;;  %v2052_v55 = vcombine.high %v6110_v49, %v6110_v49  ;;  %vm6267_vm6 = vmand %vm6223_vm5, %vm2207_vm4 }
 0x14b   : > { %v2851_v53 = vsel %vm2827_vm0, %v2846_v14, %v2850_v1  ;;  %v1754_v57 = vmax.f32 %v1717_v47, 0.0  ;;  %v2855_v22 = vshll.u32 %v5982_v44, 16  ;;  %v2676_v9 = vrot.slane %v2662_v46, %v5783_v41  ;;  %vm2266_vm9 = vmand %vm6212_vm2, %vm2242_vm3 }
 0x14c   : > { %4958 = vmatmul.mubr.msk.bf16.vlgmr.msra.gmra.mrb[0].mxu1 %vm2941_vm1, %v2851_v53  ;;  %5017 = vmatprep.mubr.msk.bf16.mxu0 %vm2941_vm1, %v2851_v53  ;;  %v2067_v26 = vrot.slane %v2053_v16, %v5783_v41  ;;  %v2068_v61 = vcombine.high %v2060_v51, %v2060_v51  ;;  %v1752_v62 = vmax.f32 %v1709_v43, 0.0  ;;  %v2620_v63 = vcombine.low %v2052_v55, %v2060_v51  ;;  %vm2269_vm10 = vmand %vm6223_vm5, %vm2242_vm3 }
 0x14d   : > { %v2104_v50 = vcombine.high %v1754_v57, %v1754_v57  ;;  %v2111_v0 = vrot.slane %v1754_v57, %v5783_v41  ;;  %4974 = vmatpush3.bf16.msra.mxu1 %v5761_v31  ;;  %v2857_v49 = vrot.slane %v2855_v22, 1  ;;  %v2853_v25 = vshrl.u32 %v5982_v44, 16 }
 0x14e   : > { %v2621_v18 = vcombine.low %v2068_v61, %v2067_v26  ;;  %v2069_v33 = vcombine.high %v2067_v26, %v2067_v26  ;;  %v2070_v5 = vcombine.high %v1752_v62, %v1752_v62  ;;  %v2077_v6 = vrot.slane %v1752_v62, %v5783_v41  ;;  %4975 = vmatprep.subr.bf16.mxu1 %v5334_v52  ;;  %v5336_v26 = vld [vmem:[%s6766_s2 + $0x38] sm:$0xff]  }
 0x14f   : > { %v2628_v31 = vrot.slane %v2620_v63, %v5783_v41  ;;  %v2118_v17 = vrot.slane %v2104_v50, %v5783_v41  ;;  %v2119_v23 = vcombine.high %v2111_v0, %v2111_v0  ;;  %v2858_v14 = vor.u32 %v2857_v49, %v2853_v25 }
 0x150   : > { %v2635_v58 = vrot.slane %v2621_v18, %v5783_v41  ;;  %v2084_v3 = vrot.slane %v2070_v5, %v5783_v41  ;;  %v2085_v37 = vcombine.high %v2077_v6, %v2077_v6  ;;  %v2637_v42 = vcombine.low %v2069_v33, %v2077_v6 }
 0x151   : > { %v2120_v30 = vcombine.high %v2118_v17, %v2118_v17  ;;  %v2678_v15 = vcombine.low %v2111_v0, %v2119_v23  ;;  %v2860_v1 = vshll.u32 %v5973_v12, 16  ;;  %4976 = vmatpush3.bf16.msra.mxu1 %v5334_v52  ;;  %v2669_v47 = vrot.slane %v2661_v48, %v5783_v41 }
 0x152   : > { %v2636_v16 = vcombine.low %v2628_v31, %v2635_v58  ;;  %v2638_v51 = vcombine.low %v2085_v37, %v2084_v3  ;;  %v2645_v43 = vrot.slane %v2637_v42, %v5783_v41  ;;  %4993 = vmatprep.subr.bf16.mxu1 %v6185_v10  ;;  %v6230_v53 = vpack.c.bf16 %v6096_v40, %v6096_v40 }
 0x153   : > { %v2679_v52 = vcombine.low %v2118_v17, %v2120_v30  ;;  %v2862_v48 = vrot.slane %v2860_v1, 1  ;;  %v2793_v34 = vsel %vm6191_vm14, %v2619_v8, 0.0  ;;  %v2677_v57 = vcombine.low %v2669_v47, %v2676_v9 }
 0x154   : > { %v2652_v22 = vrot.slane %v2638_v51, %v5783_v41  ;;  %v1722_v28 = vadd.f32 %v5774_v36, %v6064_v54  ;;  %v2790_v8 = vsel %vm6202_vm15, %v2578_v11, 0.0  ;;  %v2686_v9 = vrot.slane %v2678_v15, %v5783_v41 }
 0x155   : > { %v2693_v61 = vrot.slane %v2679_v52, %v5783_v41  ;;  %v6261_v62 = vsel %vm2827_vm0, %v2858_v14, %v2862_v48  ;;  %v2086_v63 = vcombine.high %v2084_v3, %v2084_v3  ;;  %v2784_v0 = vsel %vm6236_vm7, %v6088_v24, 0.0  ;;  %v6292_v24 = vld [vmem:[%s6766_s2 + $0x50] sm:$0xff]  }
 0x156   : > { %v2653_v50 = vcombine.low %v2645_v43, %v2652_v22  ;;  %4961 = vmatprep.mubr.msk.bf16.mxu1 %vm2941_vm1, %v6261_v62  ;;  %5018 = vmatmul.mubr.msk.bf16.vlgmr.msra.gmra.mrb[24].mxu0 %vm2941_vm1, %v6261_v62  ;;  %v1755_v11 = vmax.f32 %v1722_v28, 0.0  ;;  %v2794_v49 = vsel %vm6246_vm8, %v2636_v16, 0.0  ;;  %v6280_v33 = vpack.c.bf16 %v2784_v0, %v2784_v0 }
 0x157   : > { %v2694_v18 = vcombine.low %v2686_v9, %v2693_v61  ;;  %v2867_v5 = vshll.u32 %v6017_v59, 16  ;;  %5034 = vmatpush3.bf16.msra.mxu0 %v5767_v32  ;;  %v2797_v17 = vsel %vm6267_vm6, %v2677_v57, 0.0  ;;  %v2865_v25 = vshrl.u32 %v6017_v59, 16 }
 0x158   : > { %v2795_v6 = vsel %vm6212_vm2, %v2653_v50, 0.0  ;;  %v2121_v13 = vcombine.high %v1755_v11, %v1755_v11  ;;  %v2128_v31 = vrot.slane %v1755_v11, %v5783_v41  ;;  %5035 = vmatprep.subr.bf16.mxu0 %v5336_v26  ;;  %v6299_v58 = vpack.c.bf16 %v2790_v8, %v2790_v8 }
 0x159   : > { %v6294_v23 = vpack.c.bf16 %v2795_v6, %v2794_v49  ;;  %v2798_v32 = vsel %vm6223_vm5, %v2694_v18, 0.0  ;;  %v2869_v27 = vrot.slane %v2867_v5, 1  ;;  %v2872_v15 = vshll.u32 %v6280_v33, 16 }
 0x15a   : > { %v6302_v3 = vrot.slane %v2121_v13, %v5783_v41  ;;  %v2136_v37 = vcombine.high %v2128_v31, %v2128_v31  ;;  %v6304_v42 = vpack.c.bf16 %v2798_v32, %v2797_v17  ;;  %v2879_v14 = vshll.u32 %v6074_v2, 16 }
 0x15b   : > { %v2870_v30 = vor.u32 %v2869_v27, %v2865_v25  ;;  %5036 = vmatpush3.bf16.msra.mxu0 %v5336_v26  ;;  %v6308_v1 = vpack.c.bf16 %v2793_v34, %v2793_v34  ;;  %v2660_v47 = vrot.slane %v2086_v63, %v5783_v41  ;;  %v2884_v51 = vshll.u32 %v6230_v53, 16 }
 0x15c   : > { %v6312_v16 = vcombine.low %v2136_v37, %v6302_v3  ;;  %5053 = vmatprep.subr.bf16.mxu0 %v6292_v24  ;;  %v2874_v43 = vrot.slane %v2872_v15, 1  ;;  %v2877_v52 = vshrl.u32 %v6074_v2, 16  ;;  %v2881_v48 = vrot.slane %v2879_v14, 1 }
 0x15d   : > { %v1730_v55 = vadd.f32 %v6059_v60, %v5774_v36  ;;  %v2701_v34 = vrot.slane %v2128_v31, %v5783_v41  ;;  %v2891_v57 = vshll.u32 %v6154_v19, 16  ;;  %v2896_v40 = vshll.u32 %v6299_v58, 16 }
 0x15e   : > { %v6331_v22 = vsel %vm2827_vm0, %v2870_v30, %v2874_v43  ;;  %v2882_v28 = vor.u32 %v2881_v48, %v2877_v52  ;;  %v2886_v46 = vrot.slane %v2884_v51, 1  ;;  %v2903_v26 = vshll.u32 %v6160_v45, 16 }
 0x15f   : > { %4962 = vmatmul.mubr.msk.bf16.gmra.mrb[4].mxu1 %vm2941_vm1, %v6331_v22  ;;  %5021 = vmatprep.mubr.msk.bf16.mxu0 %vm2941_vm1, %v6331_v22  ;;  %v2889_v60 = vshrl.u32 %v6154_v19, 16  ;;  %v2893_v8 = vrot.slane %v2891_v57, 1  ;;  %v2908_v9 = vshll.u32 %v6308_v1, 16  ;;  %v2796_v20 = vsel %vm2266_vm9, %v2660_v47, 0.0 }
 0x160   : > { %v6341_v61 = vsel %vm2827_vm0, %v2882_v28, %v2886_v46  ;;  %v2901_v54 = vshrl.u32 %v6160_v45, 16  ;;  %v2905_v63 = vrot.slane %v2903_v26, 1  ;;  %v6344_v50 = vpack.c.bf16 %v2796_v20, %v2796_v20 }
 0x161   : > { %v2799_v11 = vsel %vm2269_vm10, %v2701_v34, 0.0  ;;  %4965 = vmatprep.mubr.msk.bf16.mxu1 %vm2941_vm1, %v6341_v61  ;;  %5022 = vmatmul.mubr.msk.bf16.gmra.mrb[28].mxu0 %vm2941_vm1, %v6341_v61  ;;  %v2894_v0 = vor.u32 %v2893_v8, %v2889_v60  ;;  %v2898_v49 = vrot.slane %v2896_v40, 1  ;;  %v2915_v18 = vshll.u32 %v6294_v23, 16 }
 0x162   : > { %v2906_v5 = vor.u32 %v2905_v63, %v2901_v54  ;;  %v2910_v6 = vrot.slane %v2908_v9, 1  ;;  %v2920_v13 = vshll.u32 %v6344_v50, 16  ;;  %v3407_v31 = vshll.u32 %v6304_v42, 16 }
 0x163   : > { %v6354_v17 = vsel %vm2827_vm0, %v2894_v0, %v2898_v49  ;;  %v2913_v32 = vshrl.u32 %v6294_v23, 16  ;;  %v2917_v25 = vrot.slane %v2915_v18, 1  ;;  %v1757_v27 = vmax.f32 %v1730_v55, 0.0 }
 0x164   : > { %v6357_v37 = vpack.c.bf16 %v2799_v11, %v2799_v11  ;;  %5025 = vmatprep.mubr.msk.bf16.mxu0 %vm2941_vm1, %v6354_v17  ;;  %v6362_v30 = vsel %vm2827_vm0, %v2906_v5, %v2910_v6  ;;  %v2922_v14 = vrot.slane %v2920_v13, 1  ;;  %v3208_v47 = vrot.slane %v5914_v35, 1 }
 0x165   : > { %v2918_v15 = vor.u32 %v2917_v25, %v2913_v32  ;;  %v3209_v51 = vrot.slane %v6000_v56, 1  ;;  %v3409_v43 = vrot.slane %v3407_v31, 1  ;;  %vm3204_vm11 = vcmask 1046528  }
 0x166   : > { %v3412_v52 = vshll.u32 %v6357_v37, 16  ;;  %v3405_v34 = vshrl.u32 %v6304_v42, 16  ;;  %v2161_v56 = vrot.slane %v1757_v27, %v5783_v41  ;;  %v2172_v57 = vadd.s32 9, %v5776_v38  ;;  %v5340_v27 = vld [vmem:[%s6766_s2 + $0x58] sm:$0xff]  }
 0x167   : > { %4966 = vmatmul.mubr.msk.bf16.gmra.mrb[8].mxu1 %vm2941_vm1, %v6354_v17  ;;  %v6370_v48 = vsel %vm2827_vm0, %v2918_v15, %v2922_v14  ;;  %v6373_v55 = vsel %vm3204_vm11, %v3208_v47, %v3209_v51  ;;  %v1725_v46 = vadd.f32 %v5774_v36, %v6085_v29  ;;  %v2137_v8 = vcombine.high %v6302_v3, %v6302_v3 }
 0x168   : > { %4969 = vmatprep.mubr.msk.bf16.mxu1 %vm2941_vm1, %v6362_v30  ;;  %v3410_v40 = vor.u32 %v3409_v43, %v3405_v34  ;;  %v3414_v28 = vrot.slane %v3412_v52, 1  ;;  %v2162_v26 = vcombine.high %v2161_v56, %v2161_v56  ;;  %vm2186_vm12 = vcmp.ge.s32.totalorder %v2172_v57, 1 }
 0x169   : > { %5026 = vmatmul.mubr.msk.bf16.gmra.mrb[32].mxu0 %vm2941_vm1, %v6362_v30  ;;  %v1756_v60 = vmax.f32 %v1725_v46, 0.0  ;;  %vm2196_vm13 = vcmp.le.s32.totalorder %v2172_v57, 16  ;;  %v2710_v29 = vrot.slane %v6312_v16, %v5783_v41  ;;  %v3206_v46 = vrot.slane %v5903_v21, 1  ;;  %v5342_v21 = vld [vmem:[%s6766_s2 + $0x78] sm:$0xff]  }
 0x16a   : > { %5029 = vmatprep.mubr.msk.bf16.mxu0 %vm2941_vm1, %v6370_v48  ;;  %v6389_v38 = vsel %vm2827_vm0, %v3410_v40, %v3414_v28  ;;  %v2742_v54 = vrot.slane %v2162_v26, %v5783_v41  ;;  %vm6395_vm14 = vmand %vm2186_vm12, %vm2196_vm13  ;;  %v3205_v28 = vrot.slane %v5883_v7, 1  ;;  %v3218_v36 = vrot.slane %v6230_v53, 1 }
 0x16b   : > { %v2138_v9 = vcombine.high %v1756_v60, %v1756_v60  ;;  %v2145_v20 = vrot.slane %v1756_v60, %v5783_v41  ;;  %vm2272_vm15 = vmand %vm6395_vm14, %vm2242_vm3  ;;  %v3211_v60 = vrot.slane %v5982_v44, 1  ;;  %v3224_v53 = vrot.slane %v6308_v1, 1 }
 0x16c   : > { %v2802_v18 = vsel %vm2272_vm15, %v2742_v54, 0.0  ;;  %vm6421_vm3 = vmand %vm6395_vm14, %vm2207_vm4  ;;  %v3207_v26 = vsel %vm3204_vm11, %v3205_v28, %v3206_v46  ;;  %v5343_v54 = vld [vmem:[%s6766_s2 + $0x60] sm:$0xff]   ;;  %v3647_v1 = vrot.slane %v6357_v37, 1 }
 0x16d   : > { %v2152_v3 = vrot.slane %v2138_v9, %v5783_v41  ;;  %v2153_v63 = vcombine.high %v2145_v20, %v2145_v20  ;;  %v2703_v11 = vcombine.low %v2137_v8, %v2145_v20  ;;  %v2822_v25 = vpack.c.bf16 %v2802_v18, %v2802_v18 }
 0x16e   : > { %v3212_v8 = vrot.slane %v5973_v12, 1  ;;  %v3215_v20 = vrot.slane %v6280_v33, 1  ;;  %v3220_v33 = vrot.slane %v6154_v19, 1  ;;  %v3646_v18 = vrot.slane %v6304_v42, 1 }
 0x16f   : > { %4970 = vmatmul.mubr.msk.bf16.gmra.mrb[12].mxu1 %vm2941_vm1, %v6370_v48  ;;  %v2154_v0 = vcombine.high %v2152_v3, %v2152_v3  ;;  %v2717_v16 = vrot.slane %v2703_v11, %v5783_v41  ;;  %v2719_v49 = vcombine.low %v2153_v63, %v2152_v3  ;;  %v3843_v14 = vshll.u32 %v2822_v25, 16 }
 0x170   : > { %4977 = vmatprep.mubr.msk.bf16.mxu1 %vm2941_vm1, %v5883_v7  ;;  %v4078_v47 = vrot.slane %v2822_v25, 1  ;;  %v3214_v7 = vrot.slane %v6017_v59, 1  ;;  %v3213_v9 = vsel %vm3204_vm11, %v3211_v60, %v3212_v8  ;;  %v3221_v3 = vrot.slane %v6299_v58, 1 }
 0x171   : > { %5030 = vmatmul.mubr.msk.bf16.gmra.mrb[36].mxu0 %vm2941_vm1, %v6389_v38  ;;  %v2718_v5 = vcombine.low %v2710_v29, %v2717_v16  ;;  %v2720_v6 = vcombine.low %v2154_v0, %v2161_v56  ;;  %v2727_v13 = vrot.slane %v2719_v49, %v5783_v41  ;;  %v3845_v34 = vrot.slane %v3843_v14, 1 }
 0x172   : > { %5037 = vmatprep.mubr.msk.bf16.mxu0 %vm2941_vm1, %v5914_v35  ;;  %v3216_v12 = vsel %vm3204_vm11, %v3214_v7, %v3215_v20  ;;  %v3222_v63 = vsel %vm3204_vm11, %v3220_v33, %v3221_v3  ;;  %v3223_v11 = vrot.slane %v6160_v45, 1  ;;  %v3226_v0 = vrot.slane %v6294_v23, 1 }
 0x173   : > { %v2734_v32 = vrot.slane %v2720_v6, %v5783_v41  ;;  %v2800_v15 = vsel %vm6421_vm3, %v2718_v5, 0.0  ;;  %v5341_v41 = vld [vmem:[%s6766_s2 + $0x70] sm:$0xff]   ;;  %v3227_v58 = vrot.slane %v6344_v50, 1  ;;  %v3648_v5 = vsel %vm3204_vm11, %v3646_v18, %v3647_v1  ;;  %v5344_v50 = vld [vmem:[%s6766_s2 + $0x68] sm:$0xff]  }
 0x174   : > { %v3225_v16 = vsel %vm3204_vm11, %v3223_v11, %v3224_v53 }
 0x175   : > { %v2735_v4 = vcombine.low %v2727_v13, %v2734_v32  ;;  %v3228_v49 = vsel %vm3204_vm11, %v3226_v0, %v3227_v58 }
 0x177   : > { %4978 = vmatmul.mubr.msk.bf16.vlgmr.msra.gmra.mrb[0].mxu1 %vm2941_vm1, %v5914_v35  ;;  %v2801_v35 = vsel %vm6395_vm14, %v2735_v4, 0.0 }
 0x178   : > { %4994 = vmatpush3.bf16.msra.mxu1 %v6185_v10  ;;  %4981 = vmatprep.mubr.msk.bf16.mxu1 %vm2941_vm1, %v5982_v44  ;;  %v6446_v10 = vpack.c.bf16 %v2801_v35, %v2800_v15 }
 0x179   : > { %5038 = vmatmul.mubr.msk.bf16.vlgmr.msra.gmra.mrb[24].mxu0 %vm2941_vm1, %v5982_v44  ;;  %4995 = vmatprep.subr.bf16.mxu1 %v5338_v39 }
 0x17a   : > { %5041 = vmatprep.mubr.msk.bf16.mxu0 %vm2941_vm1, %v6017_v59  ;;  %5054 = vmatpush3.bf16.msra.mxu0 %v6292_v24  ;;  %v3836_v51 = vshrl.u32 %v6446_v10, 16  ;;  %v3838_v43 = vshll.u32 %v6446_v10, 16  ;;  %v4077_v52 = vrot.slane %v6446_v10, 1 }
 0x17b   : > { %5055 = vmatprep.subr.bf16.mxu0 %v5340_v27 }
 0x17c   : > { %4996 = vmatpush3.bf16.msra.mxu1 %v5338_v39  ;;  %v3840_v24 = vrot.slane %v3838_v43, 1  ;;  %v6454_v56 = vsel %vm3204_vm11, %v4077_v52, %v4078_v47 }
 0x17d   : > { %5073 = vmatprep.subr.bf16.mxu1 %v5341_v41 }
 0x17e   : > { %5056 = vmatpush3.bf16.msra.mxu0 %v5340_v27  ;;  %v3841_v57 = vor.u32 %v3840_v24, %v3836_v51 }
 0x17f   : > { %4982 = vmatmul.mubr.msk.bf16.gmra.mrb[4].mxu1 %vm2941_vm1, %v6017_v59 }
 0x180   : > { %4985 = vmatprep.mubr.msk.bf16.mxu1 %vm2941_vm1, %v6074_v2  ;;  %v6463_v40 = vsel %vm2827_vm0, %v3841_v57, %v3845_v34 }
 0x181   : > { %5042 = vmatmul.mubr.msk.bf16.gmra.mrb[28].mxu0 %vm2941_vm1, %v6074_v2 }
 0x182   : > { %5045 = vmatprep.mubr.msk.bf16.mxu0 %vm2941_vm1, %v6154_v19 }
 0x187   : > { %4986 = vmatmul.mubr.msk.bf16.gmra.mrb[8].mxu1 %vm2941_vm1, %v6154_v19 }
 0x188   : > { %4989 = vmatprep.mubr.msk.bf16.mxu1 %vm2941_vm1, %v6160_v45 }
 0x189   : > { %5046 = vmatmul.mubr.msk.bf16.gmra.mrb[32].mxu0 %vm2941_vm1, %v6160_v45 }
 0x18a   : > { %5049 = vmatprep.mubr.msk.bf16.mxu0 %vm2941_vm1, %v6294_v23 }
 0x18f   : > { %4990 = vmatmul.mubr.msk.bf16.gmra.mrb[12].mxu1 %vm2941_vm1, %v6294_v23 }
 0x190   : > { %4997 = vmatprep.mubr.msk.bf16.mxu1 %vm2941_vm1, %v3207_v26 }
 0x191   : > { %5050 = vmatmul.mubr.msk.bf16.gmra.mrb[36].mxu0 %vm2941_vm1, %v6304_v42 }
 0x192   : > { %5057 = vmatprep.mubr.msk.bf16.mxu0 %vm2941_vm1, %v6373_v55 }
 0x197   : > { %4998 = vmatmul.mubr.msk.bf16.vlgmr.msra.gmra.mrb[0].mxu1 %vm2941_vm1, %v6373_v55  ;;  %v3217_v55 = vrot.slane %v6074_v2, 1 }
 0x198   : > { %5074 = vmatpush3.bf16.msra.mxu1 %v5341_v41  ;;  %5001 = vmatprep.mubr.msk.bf16.mxu1 %vm2941_vm1, %v3213_v9 }
 0x199   : > { %5058 = vmatmul.mubr.msk.bf16.vlgmr.msra.gmra.mrb[24].mxu0 %vm2941_vm1, %v3213_v9  ;;  %5075 = vmatprep.subr.bf16.mxu1 %v5342_v21  ;;  %v3219_v29 = vsel %vm3204_vm11, %v3217_v55, %v3218_v36 }
 0x19a   : > { %5061 = vmatprep.mubr.msk.bf16.mxu0 %vm2941_vm1, %v3216_v12 }
 0x19c   : > { %5076 = vmatpush3.bf16.msra.mxu1 %v5342_v21 }
 0x19d   : > { %5093 = vmatprep.subr.bf16.mxu1 %v5343_v54 }
 0x19f   : > { %5002 = vmatmul.mubr.msk.bf16.gmra.mrb[4].mxu1 %vm2941_vm1, %v3216_v12 }
 0x1a0   : > { %5005 = vmatprep.mubr.msk.bf16.mxu1 %vm2941_vm1, %v3219_v29 }
 0x1a1   : > { %5062 = vmatmul.mubr.msk.bf16.gmra.mrb[28].mxu0 %vm2941_vm1, %v3219_v29 }
 0x1a2   : > { %5065 = vmatprep.mubr.msk.bf16.mxu0 %vm2941_vm1, %v3222_v63 }
 0x1a7   : > { %5006 = vmatmul.mubr.msk.bf16.gmra.mrb[8].mxu1 %vm2941_vm1, %v3222_v63 }
 0x1a8   : > { %5009 = vmatprep.mubr.msk.bf16.mxu1 %vm2941_vm1, %v3225_v16 }
 0x1a9   : > { %5066 = vmatmul.mubr.msk.bf16.gmra.mrb[32].mxu0 %vm2941_vm1, %v3225_v16 }
 0x1aa   : > { %5069 = vmatprep.mubr.msk.bf16.mxu0 %vm2941_vm1, %v3228_v49 }
 0x1af   : > { %5010 = vmatmul.mubr.msk.bf16.gmra.mrb[12].mxu1 %vm2941_vm1, %v3228_v49 }
 0x1b0   : > { %5077 = vmatprep.mubr.msk.bf16.mxu1 %vm2941_vm1, %v6261_v62  ;;  %v5345_v62 = vld [vmem:[%s6766_s2 + $0x80] sm:$0xff]  }
 0x1b1   : > { %5070 = vmatmul.mubr.msk.bf16.gmra.mrb[36].mxu0 %vm2941_vm1, %v3648_v5 }
 0x1b7   : > { %5078 = vmatmul.mubr.msk.bf16.vlgmr.msra.gmra.mrb[16].mxu1 %vm2941_vm1, %v6331_v22  ;;  %v5346_v22 = vld [vmem:[%s6766_s2 + $0x88] sm:$0xff]  }
 0x1b8   : > { %5094 = vmatpush3.bf16.msra.mxu1 %v5343_v54  ;;  %5081 = vmatprep.mubr.msk.bf16.mxu1 %vm2941_vm1, %v6341_v61 }
 0x1b9   : > { %5095 = vmatprep.subr.bf16.mxu1 %v5344_v50 }
 0x1bc   : > { %5096 = vmatpush3.bf16.msra.mxu1 %v5344_v50 }
 0x1bd   : > { %5113 = vmatprep.subr.bf16.mxu1 %v5345_v62 }
 0x1bf   : > { %5082 = vmatmul.mubr.msk.bf16.gmra.mrb[20].mxu1 %vm2941_vm1, %v6354_v17 }
 0x1c0   : > { %5085 = vmatprep.mubr.msk.bf16.mxu1 %vm2941_vm1, %v6362_v30 }
 0x1c7   : > { %5086 = vmatmul.mubr.msk.bf16.gmra.mrb[24].mxu1 %vm2941_vm1, %v6370_v48 }
 0x1c8   : > { %5089 = vmatprep.mubr.msk.bf16.mxu1 %vm2941_vm1, %v6389_v38 }
 0x1cf   : > { %5090 = vmatmul.mubr.msk.bf16.gmra.mrb[28].mxu1 %vm2941_vm1, %v6463_v40 }
 0x1d0   : > { %5097 = vmatprep.mubr.msk.bf16.mxu1 %vm2941_vm1, %v5982_v44  ;;  %v5347_v44 = vld [vmem:[%s6767_s3] sm:$0xff]  }
 0x1d1   : > { %5133 = vmatprep.subr.bf16.mxu0 %v5347_v44 }
 0x1d2   : > { %5134 = vmatpush3.bf16.msra.mxu0 %v5347_v44 }
 0x1d7   : > { %5098 = vmatmul.mubr.msk.bf16.vlgmr.msra.gmra.mrb[16].mxu1 %vm2941_vm1, %v6017_v59  ;;  %v5348_v59 = vld [vmem:[%s6767_s3 + $0x8] sm:$0xff]  }
 0x1d8   : > { %5114 = vmatpush3.bf16.msra.mxu1 %v5345_v62  ;;  %5101 = vmatprep.mubr.msk.bf16.mxu1 %vm2941_vm1, %v6074_v2 }
 0x1d9   : > { %5115 = vmatprep.subr.bf16.mxu1 %v5346_v22  ;;  %5135 = vmatprep.subr.bf16.mxu0 %v5348_v59 }
 0x1da   : > { %5136 = vmatpush3.bf16.msra.mxu0 %v5348_v59 }
 0x1dc   : > { %5116 = vmatpush3.bf16.msra.mxu1 %v5346_v22 }
 0x1df   : > { %5102 = vmatmul.mubr.msk.bf16.gmra.mrb[20].mxu1 %vm2941_vm1, %v6154_v19 }
 0x1e0   : > { %5105 = vmatprep.mubr.msk.bf16.mxu1 %vm2941_vm1, %v6160_v45 }
 0x1e7   : > { %5106 = vmatmul.mubr.msk.bf16.gmra.mrb[24].mxu1 %vm2941_vm1, %v6294_v23 }
 0x1e8   : > { %5109 = vmatprep.mubr.msk.bf16.mxu1 %vm2941_vm1, %v6304_v42 }
 0x1ef   : > { %5110 = vmatmul.mubr.msk.bf16.gmra.mrb[28].mxu1 %vm2941_vm1, %v6446_v10 }
 0x1f0   : > { %5117 = vmatprep.mubr.msk.bf16.mxu1 %vm2941_vm1, %v3213_v9 }
 0x1f7   : > { %5118 = vmatmul.mubr.msk.bf16.vlgmr.msra.gmra.mrb[16].mxu1 %vm2941_vm1, %v3216_v12 }
 0x1f8   : > { %5121 = vmatprep.mubr.msk.bf16.mxu1 %vm2941_vm1, %v3219_v29 }
 0x1ff   : > { %5122 = vmatmul.mubr.msk.bf16.gmra.mrb[20].mxu1 %vm2941_vm1, %v3222_v63 }
 0x200   : > { %5125 = vmatprep.mubr.msk.bf16.mxu1 %vm2941_vm1, %v3225_v16 }
 0x207   : > { %5126 = vmatmul.mubr.msk.bf16.gmra.mrb[24].mxu1 %vm2941_vm1, %v3228_v49 }
 0x208   : > { %5129 = vmatprep.mubr.msk.bf16.mxu1 %vm2941_vm1, %v3648_v5 }
 0x20f   : > { %5130 = vmatmul.mubr.msk.bf16.gmra.mrb[28].mxu1 %vm2941_vm1, %v6454_v56 }
 0x26a   : > { %v4999_v2 = vpop.f32.mrb[0].mxu1 }
 0x26b   : > { %3385 = vst.msk [vmem:[#allocation2 + $0x10] sm:$0xff] %vm2941_vm1, %v4999_v2  ;;  %v3304_v19 = vpop.f32.mrb[1].mxu1 }
 0x26c   : > { %3383 = vst.msk [vmem:[#allocation2] sm:$0xff] %vm2941_vm1, %v3304_v19  ;;  %v5000_v45 = vpop.f32.mrb[2].mxu1  ;;  %v5059_v23 = vpop.f32.mrb[24].mxu0 }
 0x26d   : > { %3386 = vst.msk [vmem:[#allocation2 + $0x18] sm:$0xff] %vm2941_vm1, %v5000_v45  ;;  %v3307_v42 = vpop.f32.mrb[3].mxu1  ;;  %v3703_v61 = vpop.f32.mrb[25].mxu0 }
 0x26e   : > { %3384 = vst.msk [vmem:[#allocation2 + $0x8] sm:$0xff] %vm2941_vm1, %v3307_v42  ;;  %v5060_v17 = vpop.f32.mrb[26].mxu0 }
 0x26f   : > { %v3706_v37 = vpop.f32.mrb[27].mxu0 }
 0x272   : > { %v3784_v30 = vld [vmem:[#allocation2 + $0x10] sm:$0xff]  ;;  %v5003_v48 = vpop.f32.mrb[4].mxu1 }
 0x273   : > { %v3800_v38 = vadd.f32 %v5059_v23, %v3784_v30  ;;  %v3782_v6 = vld [vmem:[#allocation2] sm:$0xff]  ;;  %3389 = vst.msk [vmem:[#allocation2 + $0x30] sm:$0xff] %vm2941_vm1, %v5003_v48  ;;  %v3320_v13 = vpop.f32.mrb[5].mxu1 }
 0x274   : > { %v3798_v39 = vadd.f32 %v3782_v6, %v3703_v61  ;;  %v3785_v31 = vld [vmem:[#allocation2 + $0x18] sm:$0xff]  ;;  %3387 = vst.msk [vmem:[#allocation2 + $0x20] sm:$0xff] %vm2941_vm1, %v3320_v13  ;;  %v5004_v32 = vpop.f32.mrb[6].mxu1  ;;  %v5063_v25 = vpop.f32.mrb[28].mxu0 }
 0x275   : > { %3816 = vst.msk [vmem:[#allocation2 + $0x10] sm:$0xff] %vm2941_vm1, %v3800_v38  ;;  %v3801_v27 = vadd.f32 %v5060_v17, %v3785_v31  ;;  %v3783_v4 = vld [vmem:[#allocation2 + $0x8] sm:$0xff]  ;;  %3390 = vst.msk [vmem:[#allocation2 + $0x38] sm:$0xff] %vm2941_vm1, %v5004_v32  ;;  %v3323_v15 = vpop.f32.mrb[7].mxu1  ;;  %v3719_v41 = vpop.f32.mrb[29].mxu0 }
 0x276   : > { %3814 = vst.msk [vmem:[#allocation2] sm:$0xff] %vm2941_vm1, %v3798_v39  ;;  %v3799_v35 = vadd.f32 %v3783_v4, %v3706_v37  ;;  %3388 = vst.msk [vmem:[#allocation2 + $0x28] sm:$0xff] %vm2941_vm1, %v3323_v15  ;;  %v5064_v10 = vpop.f32.mrb[30].mxu0 }
 0x277   : > { %3817 = vst.msk [vmem:[#allocation2 + $0x18] sm:$0xff] %vm2941_vm1, %v3801_v27  ;;  %v3722_v14 = vpop.f32.mrb[31].mxu0  ;;  %v6620_v27 = vld [vmem:[%s6769_s5] ss:$0 sm:$0xff] }
 0x278   : > { %3815 = vst.msk [vmem:[#allocation2 + $0x8] sm:$0xff] %vm2941_vm1, %v3799_v35 }
 0x27a   : > { %v3788_v47 = vld [vmem:[#allocation2 + $0x30] sm:$0xff]  ;;  %v5007_v51 = vpop.f32.mrb[8].mxu1 }
 0x27b   : > { %v3804_v43 = vadd.f32 %v5063_v25, %v3788_v47  ;;  %v3786_v52 = vld [vmem:[#allocation2 + $0x20] sm:$0xff]  ;;  %3393 = vst.msk [vmem:[#allocation2 + $0x50] sm:$0xff] %vm2941_vm1, %v5007_v51  ;;  %v3336_v24 = vpop.f32.mrb[9].mxu1 }
 0x27c   : > { %v3802_v34 = vadd.f32 %v3786_v52, %v3719_v41  ;;  %v3789_v56 = vld [vmem:[#allocation2 + $0x38] sm:$0xff]  ;;  %3391 = vst.msk [vmem:[#allocation2 + $0x40] sm:$0xff] %vm2941_vm1, %v3336_v24  ;;  %v5008_v57 = vpop.f32.mrb[10].mxu1  ;;  %v5067_v40 = vpop.f32.mrb[32].mxu0  ;;  %v4215_v19 = vld [vmem:[#allocation2 + $0x10] sm:$0xff] }
 0x27d   : > { %3820 = vst.msk [vmem:[#allocation2 + $0x30] sm:$0xff] %vm2941_vm1, %v3804_v43  ;;  %v3805_v28 = vadd.f32 %v5064_v10, %v3789_v56  ;;  %v3787_v46 = vld [vmem:[#allocation2 + $0x28] sm:$0xff]  ;;  %3394 = vst.msk [vmem:[#allocation2 + $0x58] sm:$0xff] %vm2941_vm1, %v5008_v57  ;;  %v3339_v26 = vpop.f32.mrb[11].mxu1  ;;  %v3735_v60 = vpop.f32.mrb[33].mxu0  ;;  %v4213_v42 = vld [vmem:[#allocation2] sm:$0xff] }
 0x27e   : > { %3818 = vst.msk [vmem:[#allocation2 + $0x20] sm:$0xff] %vm2941_vm1, %v3802_v34  ;;  %v3803_v8 = vadd.f32 %v3787_v46, %v3722_v14  ;;  %3392 = vst.msk [vmem:[#allocation2 + $0x48] sm:$0xff] %vm2941_vm1, %v3339_v26  ;;  %v5068_v7 = vpop.f32.mrb[34].mxu0  ;;  %v4216_v37 = vld [vmem:[#allocation2 + $0x18] sm:$0xff] }
 0x27f   : > { %3821 = vst.msk [vmem:[#allocation2 + $0x38] sm:$0xff] %vm2941_vm1, %v3805_v28  ;;  %v3738_v21 = vpop.f32.mrb[35].mxu0  ;;  %v4214_v38 = vld [vmem:[#allocation2 + $0x8] sm:$0xff] }
 0x280   : > { %3819 = vst.msk [vmem:[#allocation2 + $0x28] sm:$0xff] %vm2941_vm1, %v3803_v8 }
 0x282   : > { %v3792_v9 = vld [vmem:[#allocation2 + $0x50] sm:$0xff]  ;;  %v5011_v20 = vpop.f32.mrb[12].mxu1 }
 0x283   : > { %v3808_v12 = vadd.f32 %v5067_v40, %v3792_v9  ;;  %v3790_v54 = vld [vmem:[#allocation2 + $0x40] sm:$0xff]  ;;  %3397 = vst.msk [vmem:[#allocation2 + $0x70] sm:$0xff] %vm2941_vm1, %v5011_v20  ;;  %v3352_v55 = vpop.f32.mrb[13].mxu1 }
 0x284   : > { %v3806_v36 = vadd.f32 %v3790_v54, %v3735_v60  ;;  %v3793_v33 = vld [vmem:[#allocation2 + $0x58] sm:$0xff]  ;;  %3395 = vst.msk [vmem:[#allocation2 + $0x60] sm:$0xff] %vm2941_vm1, %v3352_v55  ;;  %v5012_v29 = vpop.f32.mrb[14].mxu1  ;;  %v5071_v3 = vpop.f32.mrb[36].mxu0  ;;  %v4219_v39 = vld [vmem:[#allocation2 + $0x30] sm:$0xff] }
 0x285   : > { %3824 = vst.msk [vmem:[#allocation2 + $0x50] sm:$0xff] %vm2941_vm1, %v3808_v12  ;;  %v3809_v63 = vadd.f32 %v5068_v7, %v3793_v33  ;;  %v3791_v11 = vld [vmem:[#allocation2 + $0x48] sm:$0xff]  ;;  %3398 = vst.msk [vmem:[#allocation2 + $0x78] sm:$0xff] %vm2941_vm1, %v5012_v29  ;;  %v3355_v53 = vpop.f32.mrb[15].mxu1  ;;  %v3751_v0 = vpop.f32.mrb[37].mxu0  ;;  %v4217_v25 = vld [vmem:[#allocation2 + $0x20] sm:$0xff] }
 0x286   : > { %3822 = vst.msk [vmem:[#allocation2 + $0x40] sm:$0xff] %vm2941_vm1, %v3806_v36  ;;  %v3807_v16 = vadd.f32 %v3791_v11, %v3738_v21  ;;  %3396 = vst.msk [vmem:[#allocation2 + $0x68] sm:$0xff] %vm2941_vm1, %v3355_v53  ;;  %v5072_v58 = vpop.f32.mrb[38].mxu0  ;;  %v4220_v41 = vld [vmem:[#allocation2 + $0x38] sm:$0xff] }
 0x287   : > { %3825 = vst.msk [vmem:[#allocation2 + $0x58] sm:$0xff] %vm2941_vm1, %v3809_v63  ;;  %v3754_v49 = vpop.f32.mrb[39].mxu0  ;;  %v4218_v47 = vld [vmem:[#allocation2 + $0x28] sm:$0xff] }
 0x288   : > { %3823 = vst.msk [vmem:[#allocation2 + $0x48] sm:$0xff] %vm2941_vm1, %v3807_v16 }
 0x28a   : > { %v3796_v18 = vld [vmem:[#allocation2 + $0x70] sm:$0xff] }
 0x28b   : > { %v3812_v1 = vadd.f32 %v5071_v3, %v3796_v18  ;;  %v3794_v5 = vld [vmem:[#allocation2 + $0x60] sm:$0xff] }
 0x28c   : > { %v3810_v50 = vadd.f32 %v3794_v5, %v3751_v0  ;;  %v3797_v62 = vld [vmem:[#allocation2 + $0x78] sm:$0xff]  ;;  %v4223_v26 = vld [vmem:[#allocation2 + $0x50] sm:$0xff] }
 0x28d   : > { %3828 = vst.msk [vmem:[#allocation2 + $0x70] sm:$0xff] %vm2941_vm1, %v3812_v1  ;;  %v3813_v22 = vadd.f32 %v5072_v58, %v3797_v62  ;;  %v3795_v44 = vld [vmem:[#allocation2 + $0x68] sm:$0xff]  ;;  %v4221_v9 = vld [vmem:[#allocation2 + $0x40] sm:$0xff] }
 0x28e   : > { %3826 = vst.msk [vmem:[#allocation2 + $0x60] sm:$0xff] %vm2941_vm1, %v3810_v50  ;;  %v3811_v59 = vadd.f32 %v3795_v44, %v3754_v49  ;;  %v4224_v55 = vld [vmem:[#allocation2 + $0x58] sm:$0xff] }
 0x28f   : > { %3829 = vst.msk [vmem:[#allocation2 + $0x78] sm:$0xff] %vm2941_vm1, %v3813_v22  ;;  %v4222_v63 = vld [vmem:[#allocation2 + $0x48] sm:$0xff] }
 0x290   : > { %3827 = vst.msk [vmem:[#allocation2 + $0x68] sm:$0xff] %vm2941_vm1, %v3811_v59 }
 0x294   : > { %v4227_v22 = vld [vmem:[#allocation2 + $0x70] sm:$0xff] }
 0x2ca   : > { %v5119_v2 = vpop.f32.mrb[16].mxu1 }
 0x2cb   : > { %v4231_v45 = vadd.f32 %v5119_v2, %v4215_v19  ;;  %v4134_v23 = vpop.f32.mrb[17].mxu1 }
 0x2cc   : > { %v4229_v61 = vadd.f32 %v4213_v42, %v4134_v23  ;;  %v5120_v17 = vpop.f32.mrb[18].mxu1 }
 0x2cd   : > { %4247 = vst.msk [vmem:[#allocation2 + $0x10] sm:$0xff] %vm2941_vm1, %v4231_v45  ;;  %v4232_v30 = vadd.f32 %v5120_v17, %v4216_v37  ;;  %v4137_v48 = vpop.f32.mrb[19].mxu1  ;;  %v4225_v45 = vld [vmem:[#allocation2 + $0x60] sm:$0xff]  ;;  %v4228_v17 = vld [vmem:[#allocation2 + $0x78] sm:$0xff] }
 0x2ce   : > { %4245 = vst.msk [vmem:[#allocation2] sm:$0xff] %vm2941_vm1, %v4229_v61  ;;  %v4230_v6 = vadd.f32 %v4214_v38, %v4137_v48 }
 0x2cf   : > { %4248 = vst.msk [vmem:[#allocation2 + $0x18] sm:$0xff] %vm2941_vm1, %v4232_v30 }
 0x2d0   : > { %4246 = vst.msk [vmem:[#allocation2 + $0x8] sm:$0xff] %vm2941_vm1, %v4230_v6  ;;  %v4226_v6 = vld [vmem:[#allocation2 + $0x68] sm:$0xff] }
 0x2d2   : > { %v5123_v13 = vpop.f32.mrb[20].mxu1 }
 0x2d3   : > { %v4235_v31 = vadd.f32 %v5123_v13, %v4219_v39  ;;  %v4150_v32 = vpop.f32.mrb[21].mxu1 }
 0x2d4   : > { %v4233_v4 = vadd.f32 %v4217_v25, %v4150_v32  ;;  %v5124_v15 = vpop.f32.mrb[22].mxu1  ;;  %v4263_v35 = vld [vmem:[#allocation2 + $0x10] sm:$0xff] }
 0x2d5   : > { %4251 = vst.msk [vmem:[#allocation2 + $0x30] sm:$0xff] %vm2941_vm1, %v4235_v31  ;;  %v4236_v10 = vadd.f32 %v5124_v15, %v4220_v41  ;;  %v4153_v14 = vpop.f32.mrb[23].mxu1  ;;  %v4261_v51 = vld [vmem:[#allocation2] sm:$0xff]  ;;  %v4286_v56 = vadd.f32 %v6620_v27, %v4263_v35 }
 0x2d6   : > { %4249 = vst.msk [vmem:[#allocation2 + $0x20] sm:$0xff] %vm2941_vm1, %v4233_v4  ;;  %v4234_v43 = vadd.f32 %v4218_v47, %v4153_v14  ;;  %v4284_v52 = vadd.f32 %v6620_v27, %v4261_v51  ;;  %v4264_v24 = vld [vmem:[#allocation2 + $0x18] sm:$0xff] }
 0x2d7   : > { %4252 = vst.msk [vmem:[#allocation2 + $0x38] sm:$0xff] %vm2941_vm1, %v4236_v10  ;;  %v4262_v34 = vld [vmem:[#allocation2 + $0x8] sm:$0xff]  ;;  %v4287_v57 = vadd.f32 %v6620_v27, %v4264_v24  ;;  %v4302_v20 = vmax.f32 %v4286_v56, 0.0 }
 0x2d8   : > { %4250 = vst.msk [vmem:[#allocation2 + $0x28] sm:$0xff] %vm2941_vm1, %v4234_v43  ;;  %v4285_v40 = vadd.f32 %v6620_v27, %v4262_v34  ;;  %v4300_v60 = vmax.f32 %v4284_v52, 0.0 }
 0x2d9   : > { %v4303_v28 = vmax.f32 %v4287_v57, 0.0 }
 0x2da   : > { %v5127_v46 = vpop.f32.mrb[24].mxu1  ;;  %v4301_v8 = vmax.f32 %v4285_v40, 0.0 }
 0x2db   : > { %v4239_v7 = vadd.f32 %v5127_v46, %v4223_v26  ;;  %v4166_v21 = vpop.f32.mrb[25].mxu1  ;;  %v4317_v11 = vpack.c.bf16 %v4303_v28, %v4302_v20 }
 0x2dc   : > { %v4237_v12 = vadd.f32 %v4221_v9, %v4166_v21  ;;  %v5128_v54 = vpop.f32.mrb[26].mxu1  ;;  %v4316_v36 = vpack.c.bf16 %v4301_v8, %v4300_v60  ;;  %v4267_v33 = vld [vmem:[#allocation2 + $0x30] sm:$0xff] }
 0x2dd   : > { %4255 = vst.msk [vmem:[#allocation2 + $0x50] sm:$0xff] %vm2941_vm1, %v4239_v7  ;;  %v4240_v29 = vadd.f32 %v5128_v54, %v4224_v55  ;;  %v4169_v3 = vpop.f32.mrb[27].mxu1  ;;  %v4265_v53 = vld [vmem:[#allocation2 + $0x20] sm:$0xff]  ;;  %v4290_v18 = vadd.f32 %v6620_v27, %v4267_v33 }
 0x2de   : > { %4253 = vst.msk [vmem:[#allocation2 + $0x40] sm:$0xff] %vm2941_vm1, %v4237_v12  ;;  %v4238_v0 = vadd.f32 %v4222_v63, %v4169_v3  ;;  %5137 = vmatprep.mubr.msk.bf16.mxu0 %vm2941_vm1, %v4316_v36  ;;  %v4288_v16 = vadd.f32 %v6620_v27, %v4265_v53  ;;  %v4268_v58 = vld [vmem:[#allocation2 + $0x38] sm:$0xff]  ;;  %v6662_v12 = vld [vmem:[%s6770_s6] ss:$0 sm:$0xff] }
 0x2df   : > { %4256 = vst.msk [vmem:[#allocation2 + $0x58] sm:$0xff] %vm2941_vm1, %v4240_v29  ;;  %5138 = vmatmul.mubr.msk.bf16.vlgmr.msra.gmra.mrb[40].mxu0 %vm2941_vm1, %v4317_v11  ;;  %v4266_v49 = vld [vmem:[#allocation2 + $0x28] sm:$0xff]  ;;  %v4291_v1 = vadd.f32 %v6620_v27, %v4268_v58  ;;  %v4306_v23 = vmax.f32 %v4290_v18, 0.0 }
 0x2e0   : > { %4254 = vst.msk [vmem:[#allocation2 + $0x48] sm:$0xff] %vm2941_vm1, %v4238_v0  ;;  %v4289_v5 = vadd.f32 %v6620_v27, %v4266_v49  ;;  %v4304_v44 = vmax.f32 %v4288_v16, 0.0 }
 0x2e1   : > { %v4307_v50 = vmax.f32 %v4291_v1, 0.0 }
 0x2e2   : > { %v5131_v62 = vpop.f32.mrb[28].mxu1  ;;  %v4305_v59 = vmax.f32 %v4289_v5, 0.0 }
 0x2e3   : > { %v4243_v2 = vadd.f32 %v5131_v62, %v4227_v22  ;;  %v4182_v19 = vpop.f32.mrb[29].mxu1  ;;  %v4319_v13 = vpack.c.bf16 %v4307_v50, %v4306_v23 }
 0x2e4   : > { %v4241_v42 = vadd.f32 %v4225_v45, %v4182_v19  ;;  %v5132_v61 = vpop.f32.mrb[30].mxu1  ;;  %v4318_v37 = vpack.c.bf16 %v4305_v59, %v4304_v44  ;;  %v4271_v30 = vld [vmem:[#allocation2 + $0x50] sm:$0xff] }
 0x2e5   : > { %4259 = vst.msk [vmem:[#allocation2 + $0x70] sm:$0xff] %vm2941_vm1, %v4243_v2  ;;  %v4244_v48 = vadd.f32 %v5132_v61, %v4228_v17  ;;  %v4185_v38 = vpop.f32.mrb[31].mxu1  ;;  %v4269_v39 = vld [vmem:[#allocation2 + $0x40] sm:$0xff]  ;;  %v4294_v15 = vadd.f32 %v6620_v27, %v4271_v30 }
 0x2e6   : > { %4257 = vst.msk [vmem:[#allocation2 + $0x60] sm:$0xff] %vm2941_vm1, %v4241_v42  ;;  %v4242_v31 = vadd.f32 %v4226_v6, %v4185_v38  ;;  %5141 = vmatprep.mubr.msk.bf16.mxu0 %vm2941_vm1, %v4318_v37  ;;  %v4292_v32 = vadd.f32 %v6620_v27, %v4269_v39  ;;  %v4272_v25 = vld [vmem:[#allocation2 + $0x58] sm:$0xff] }
 0x2e7   : > { %4260 = vst.msk [vmem:[#allocation2 + $0x78] sm:$0xff] %vm2941_vm1, %v4244_v48  ;;  %5142 = vmatmul.mubr.msk.bf16.gmra.mrb[44].mxu0 %vm2941_vm1, %v4319_v13  ;;  %v4270_v4 = vld [vmem:[#allocation2 + $0x48] sm:$0xff]  ;;  %v4295_v41 = vadd.f32 %v6620_v27, %v4272_v25  ;;  %v4310_v51 = vmax.f32 %v4294_v15, 0.0 }
 0x2e8   : > { %4258 = vst.msk [vmem:[#allocation2 + $0x68] sm:$0xff] %vm2941_vm1, %v4242_v31  ;;  %v4293_v35 = vadd.f32 %v6620_v27, %v4270_v4  ;;  %v4308_v14 = vmax.f32 %v4292_v32, 0.0 }
 0x2e9   : > { %v4311_v10 = vmax.f32 %v4295_v41, 0.0 }
 0x2ea   : > { %v4309_v47 = vmax.f32 %v4293_v35, 0.0 }
 0x2eb   : > { %v4321_v24 = vpack.c.bf16 %v4311_v10, %v4310_v51 }
 0x2ec   : > { %v4320_v43 = vpack.c.bf16 %v4309_v47, %v4308_v14  ;;  %v4275_v52 = vld [vmem:[#allocation2 + $0x70] sm:$0xff] }
 0x2ed   : > { %v4273_v34 = vld [vmem:[#allocation2 + $0x60] sm:$0xff]  ;;  %v4298_v28 = vadd.f32 %v6620_v27, %v4275_v52 }
 0x2ee   : > { %5145 = vmatprep.mubr.msk.bf16.mxu0 %vm2941_vm1, %v4320_v43  ;;  %v4296_v56 = vadd.f32 %v6620_v27, %v4273_v34  ;;  %v4276_v57 = vld [vmem:[#allocation2 + $0x78] sm:$0xff] }
 0x2ef   : > { %5146 = vmatmul.mubr.msk.bf16.gmra.mrb[48].mxu0 %vm2941_vm1, %v4321_v24  ;;  %v4274_v40 = vld [vmem:[#allocation2 + $0x68] sm:$0xff]  ;;  %v4299_v46 = vadd.f32 %v6620_v27, %v4276_v57  ;;  %v4314_v21 = vmax.f32 %v4298_v28, 0.0 }
 0x2f0   : > { %v4297_v26 = vadd.f32 %v6620_v27, %v4274_v40  ;;  %v4312_v8 = vmax.f32 %v4296_v56, 0.0 }
 0x2f1   : > { %v4315_v60 = vmax.f32 %v4299_v46, 0.0 }
 0x2f2   : > { %v4313_v7 = vmax.f32 %v4297_v26, 0.0 }
 0x2f3   : > { %v4323_v20 = vpack.c.bf16 %v4315_v60, %v4314_v21 }
 0x2f4   : > { %v4322_v9 = vpack.c.bf16 %v4313_v7, %v4312_v8 }
 0x2f6   : > { %5149 = vmatprep.mubr.msk.bf16.mxu0 %vm2941_vm1, %v4322_v9 }
 0x2f7   : > { %5150 = vmatmul.mubr.msk.bf16.gmra.mrb[52].mxu0 %vm2941_vm1, %v4323_v20 }
 0x3b2   : > { %v5139_v54 = vpop.f32.mrb[40].mxu0 }
 0x3b3   : > { %v4414_v27 = vadd.f32 %v5139_v54, %v6662_v12  ;;  %v4405_v55 = vpop.f32.mrb[41].mxu0 }
 0x3b4   : > { %v4406_v36 = vadd.f32 %v6662_v12, %v4405_v55  ;;  %v5140_v33 = vpop.f32.mrb[42].mxu0 }
 0x3b5   : > { %v4470_v29 = vmax.f32 %v4414_v27, 0.0  ;;  %v4417_v3 = vadd.f32 %v5140_v33, %v6662_v12  ;;  %v4408_v63 = vpop.f32.mrb[43].mxu0 }
 0x3b6   : > { %v4468_v11 = vmax.f32 %v4406_v36, 0.0  ;;  %v4409_v53 = vadd.f32 %v6662_v12, %v4408_v63 }
 0x3b7   : > { %4486 = vst [vmem:[%s6670_s17 + $0x10] sm:$0xff] %v4470_v29  ;;  %v4471_v0 = vmax.f32 %v4417_v3, 0.0 }
 0x3b8   : > { %4484 = vst [vmem:[%s6670_s17] sm:$0xff] %v4468_v11  ;;  %v4469_v16 = vmax.f32 %v4409_v53, 0.0 }
 0x3b9   : > { %4487 = vst [vmem:[%s6670_s17 + $0x18] sm:$0xff] %v4471_v0 }
 0x3ba   : > { %4485 = vst [vmem:[%s6670_s17 + $0x8] sm:$0xff] %v4469_v16  ;;  %v5143_v58 = vpop.f32.mrb[44].mxu0 }
 0x3bb   : > { %v4430_v49 = vadd.f32 %v5143_v58, %v6662_v12  ;;  %v4421_v18 = vpop.f32.mrb[45].mxu0 }
 0x3bc   : > { %v4422_v1 = vadd.f32 %v6662_v12, %v4421_v18  ;;  %v5144_v5 = vpop.f32.mrb[46].mxu0 }
 0x3bd   : > { %v4474_v50 = vmax.f32 %v4430_v49, 0.0  ;;  %v4433_v62 = vadd.f32 %v5144_v5, %v6662_v12  ;;  %v4424_v22 = vpop.f32.mrb[47].mxu0 }
 0x3be   : > { %v4472_v44 = vmax.f32 %v4422_v1, 0.0  ;;  %v4425_v59 = vadd.f32 %v6662_v12, %v4424_v22 }
 0x3bf   : > { %4490 = vst [vmem:[%s6670_s17 + $0x30] sm:$0xff] %v4474_v50  ;;  %v4475_v2 = vmax.f32 %v4433_v62, 0.0 }
 0x3c0   : > { %4488 = vst [vmem:[%s6670_s17 + $0x20] sm:$0xff] %v4472_v44  ;;  %v4473_v19 = vmax.f32 %v4425_v59, 0.0 }
 0x3c1   : > { %4491 = vst [vmem:[%s6670_s17 + $0x38] sm:$0xff] %v4475_v2 }
 0x3c2   : > { %4489 = vst [vmem:[%s6670_s17 + $0x28] sm:$0xff] %v4473_v19  ;;  %v5147_v45 = vpop.f32.mrb[48].mxu0 }
 0x3c3   : > { %v4446_v23 = vadd.f32 %v5147_v45, %v6662_v12  ;;  %v4437_v42 = vpop.f32.mrb[49].mxu0 }
 0x3c4   : > { %v4438_v61 = vadd.f32 %v6662_v12, %v4437_v42  ;;  %v5148_v17 = vpop.f32.mrb[50].mxu0 }
 0x3c5   : > { %v4478_v37 = vmax.f32 %v4446_v23, 0.0  ;;  %v4449_v30 = vadd.f32 %v5148_v17, %v6662_v12  ;;  %v4440_v48 = vpop.f32.mrb[51].mxu0 }
 0x3c6   : > { %v4476_v38 = vmax.f32 %v4438_v61, 0.0  ;;  %v4441_v6 = vadd.f32 %v6662_v12, %v4440_v48 }
 0x3c7   : > { %4494 = vst [vmem:[%s6670_s17 + $0x50] sm:$0xff] %v4478_v37  ;;  %v4479_v13 = vmax.f32 %v4449_v30, 0.0 }
 0x3c8   : > { %4492 = vst [vmem:[%s6670_s17 + $0x40] sm:$0xff] %v4476_v38  ;;  %v4477_v39 = vmax.f32 %v4441_v6, 0.0 }
 0x3c9   : > { %4495 = vst [vmem:[%s6670_s17 + $0x58] sm:$0xff] %v4479_v13 }
 0x3ca   : > { %4493 = vst [vmem:[%s6670_s17 + $0x48] sm:$0xff] %v4477_v39  ;;  %v5151_v31 = vpop.f32.mrb[52].mxu0 }
 0x3cb   : > { %v4462_v32 = vadd.f32 %v5151_v31, %v6662_v12  ;;  %v4453_v25 = vpop.f32.mrb[53].mxu0 }
 0x3cc   : > { %v4454_v4 = vadd.f32 %v6662_v12, %v4453_v25  ;;  %v5152_v15 = vpop.f32.mrb[54].mxu0 }
 0x3cd   : > { %v4482_v41 = vmax.f32 %v4462_v32, 0.0  ;;  %v4465_v35 = vadd.f32 %v5152_v15, %v6662_v12  ;;  %v4456_v10 = vpop.f32.mrb[55].mxu0 }
 0x3ce   : > { %v4480_v14 = vmax.f32 %v4454_v4, 0.0  ;;  %v4457_v47 = vadd.f32 %v6662_v12, %v4456_v10 }
 0x3cf   : > { %4498 = vst [vmem:[%s6670_s17 + $0x70] sm:$0xff] %v4482_v41  ;;  %v4483_v51 = vmax.f32 %v4465_v35, 0.0 }
 0x3d0   : > { %4496 = vst [vmem:[%s6670_s17 + $0x60] sm:$0xff] %v4480_v14  ;;  %v4481_v43 = vmax.f32 %v4457_v47, 0.0 }
 0x3d1   : > { %4499 = vst [vmem:[%s6670_s17 + $0x78] sm:$0xff] %v4483_v51 }
 0x3d2   : > { %4497 = vst [vmem:[%s6670_s17 + $0x68] sm:$0xff] %v4481_v43 }
 0x3d3   : > { %5362 = shalt.err (!%p5359_p6)
}
 0x3d4   : > { %s5363_s9 = scalar_lea.hbm %s6703_s12, 2048  ;;  %s5367_s27 = scalar_lea.hbm %s6771_s7, 8192 }
 0x3d5   : > { %p5364_p7 = scmp.ne.s32.totalorder %s6703_s12, %s5363_s9  ;;  %p5368_p11 = scmp.lt.u32.totalorder %s6703_s12, %s6771_s7 }
 0x3d6   : > { %p5369_p12 = scmp.lt.u32.totalorder %s5367_s27, %s5363_s9  ;;  %p5371_p0 = scmp.lt.u32.totalorder %s5363_s9, %s6703_s12 }
 0x3d7   : > { %p5365_p9 = pnand %p5364_p7, %p5541_p3 }
 0x3d8   : > { %p5370_p13 = por %p5369_p12, %p5368_p11 }
 0x3d9   : > { %p5366_p10 = pneg %p5365_p9 }
 0x3da   : > { %p5372_p1 = por %p5371_p0, %p5370_p13 }
 0x3dc   : > { %p5373_p2 = pnand %p5372_p1, %p5366_p10 }
 0x3de   : > { %5376 = shalt.err (!%p5373_p2)
}
 0x3df   : > { %s5448_s13 = smov 128   ;;  %s5449_s16 = smov 8  }
 0x3e0   : > { %5250 = dma.vmem_to_hbm [thread:$0]  (%p5541_p3), %s6705_s28, 2048, %s6703_s12, %s6712_s10, %s5448_s13, %s5448_s13, %s5449_s16  }
 0x3e1 PF: > { %p5256_p4 = scmp.ge.s32.totalorder %s5443_s8, 2  ;;  %s4532_s18 = sand.u32 1, %s5415_s24  }
 0x3e2   : > { %s4533_s20 = scalar_lea.sflag [#allocation4], %s4532_s18 }
 0x3e3   : > { %p5253_p5 = pnand %p5256_p4, %p5550_p8 }
 0x3e5   : > { %5410 = dma.done.wait (!%p5253_p5), %s4533_s20, 2048  }
 0x3e6   : > { %5412 = vsyncadd (!%p5253_p5), %s4533_s20, 4294965248  ;;  %s20_s8 = sadd.s32 1, %s5443_s8   ;;  %s6828_s14 = sld [smem:[#allocation6_spill]] }
 0x3e7   : > { %p17_p6 = scmp.ge.s32.totalorder %s20_s8, 6   ;;  %s6829_s24 = smov %s5419_s25 }
 0x3e8   : > { %s6830_s25 = smov %s5423_s26  ;;  %s6831_s26 = smov %s5559_s19 }
 0x3e9   : > { %s6832_s27 = smov %s5435_s29  ;;  %s6833_s28 = smov %s5439_s30 }
 0x3ea   : > { %s6834_s29 = smov %s6837_s11  ;;  %19 = sbr.rel (!%p17_p6) target bundleno = 5 (0x5), region = 92 }
 0x3ec   : > { %s6835_s30 = smov %s6828_s14 }
 0x3f1   :  { %4538 = vsyncpa [#allocation4], 1 }
 0x3f2   :  { %4540 = vsyncpa [#allocation4 + $0x1], 1 }

</bundles_post_ra>
